<compile_context>
chip_gen: v5e
topology: v5e:2x2
jax: 0.10.0
libtpu: 0.0.40
codegen_flags: <defaults>
</compile_context>

<pallas_src>
import functools

import jax
import jax.numpy as jnp
from jax.experimental import pallas as pl
from jax.experimental.pallas import tpu as pltpu


def _lstm_fc_kernel(x_ref, wih_ref, whh_ref, b_ref, wfc_ref, bfc_ref,
                    out_ref, h_ref, c_ref, *, seq_len, masked):
    # x_ref:   (T_BLK, B_pad, D)  time-major input chunk (streamed, f32)
    # wih_ref: (D, 4H)            W_ih^T   (weight dtype)
    # whh_ref: (H, 4H)            W_hh^T   (weight dtype)
    # b_ref:   (1, 4H)            b_ih + b_hh (f32)
    # wfc_ref: (H, O_pad)         W_fc^T   (weight dtype, lane-padded)
    # bfc_ref: (1, O_pad)         b_fc     (f32, lane-padded)
    # out_ref: (B_pad, O_pad)     written once, on the last grid step
    # h_ref/c_ref: (B_pad, H) f32 recurrent state, persists across grid steps
    tb = pl.program_id(0)
    n_tb = pl.num_programs(0)
    t_blk, b_pad, d = x_ref.shape
    H = whh_ref.shape[0]
    wdtype = whh_ref.dtype

    @pl.when(tb == 0)
    def _init():
        h_ref[...] = jnp.zeros_like(h_ref)
        c_ref[...] = jnp.zeros_like(c_ref)

    # Hoisted input projection for the whole chunk: ONE (T_BLK*B_pad, D)x(D, 4H)
    # MXU matmul + bias, removed from the serial per-step critical path.
    x2d = x_ref[...].reshape(t_blk * b_pad, d).astype(wdtype)
    proj = (jnp.dot(x2d, wih_ref[...], preferred_element_type=jnp.float32)
            + b_ref[...])
    proj = proj.reshape(t_blk, b_pad, 4 * H)

    h = h_ref[...]
    c = c_ref[...]
    # Static unroll over the chunk: each step is a single (B_pad,H)@(H,4H) matmul
    # plus f32 gate math.  whh_ref is read inside the dot (not held as a value).
    for t_local in range(t_blk):
        gates = proj[t_local] + jnp.dot(
            h.astype(wdtype), whh_ref[...], preferred_element_type=jnp.float32)
        i_g = jax.nn.sigmoid(gates[:, 0:H])
        f_g = jax.nn.sigmoid(gates[:, H:2 * H])
        g_g = jnp.tanh(gates[:, 2 * H:3 * H])
        o_g = jax.nn.sigmoid(gates[:, 3 * H:4 * H])
        c_new = f_g * c + i_g * g_g
        h_new = o_g * jnp.tanh(c_new)
        if masked:  # only traced when T was padded to a multiple of T_BLK
            valid = (tb * t_blk + t_local) < seq_len
            h = jnp.where(valid, h_new, h)
            c = jnp.where(valid, c_new, c)
        else:
            h, c = h_new, c_new

    h_ref[...] = h
    c_ref[...] = c

    @pl.when(tb == n_tb - 1)
    def _finalize():
        # Lane-dense (B_pad, O_pad=128) store: full, unmasked vst path.
        out_ref[...] = (
            jnp.dot(h.astype(wdtype), wfc_ref[...],
                    preferred_element_type=jnp.float32)
            + bfc_ref[...])


def _round_up(n, m):
    return ((n + m - 1) // m) * m


def lstm_model_forward(x, params, *, weight_dtype=jnp.float32):
    """Forward pass matching LSTMModel: fc(lstm(x)[:, -1, :]).

    x: (B, T, input_dim) float32 (batch-first, like the PyTorch module);
       2-D input (B, input_dim) is treated as seq_len = 1.
    weight_dtype: jnp.float32 (exact) or jnp.bfloat16 (v6e/v7x MXU fast path;
       gate math and accumulation stay f32).
    """
    if x.ndim == 2:
        x = x[:, None, :]
    B, T, D = x.shape

    w_ih, w_hh = params["w_ih"], params["w_hh"]
    b_ih, b_hh = params["b_ih"], params["b_hh"]
    w_fc, b_fc = params["w_fc"], params["b_fc"]
    H = w_hh.shape[1]
    O = w_fc.shape[0]

    # --- pad to TPU-friendly shapes (sliced off after the call) ---
    B_pad = max(8, _round_up(B, 8))        # sublane-full state / output rows
    O_pad = max(128, _round_up(O, 128))    # lane-dense output store

    # Time chunking: stream x over a grid on T so it never has to be fully
    # resident in VMEM (matters for long T and for v7x's 64 MiB VMEM).
    T_BLK = T if T <= 16 else 16
    T_pad = _round_up(T, T_BLK)
    masked = (T_pad != T)

    # --- glue: layout + dtype prep (plain JAX, outside the kernel) ---
    x_tm = jnp.transpose(x, (1, 0, 2)).astype(jnp.float32)         # (T, B, D)
    x_tm = jnp.pad(x_tm, ((0, T_pad - T), (0, B_pad - B), (0, 0)))  # (T_pad, B_pad, D)

    wih_t = jnp.transpose(w_ih).astype(weight_dtype)                # (D, 4H)
    whh_t = jnp.transpose(w_hh).astype(weight_dtype)                # (H, 4H)
    b_comb = (b_ih + b_hh).reshape(1, 4 * H).astype(jnp.float32)    # (1, 4H)
    wfc_t = jnp.pad(jnp.transpose(w_fc),
                    ((0, 0), (0, O_pad - O))).astype(weight_dtype)  # (H, O_pad)
    bfc = jnp.pad(b_fc, (0, O_pad - O)).reshape(1, O_pad).astype(jnp.float32)

    kernel = functools.partial(_lstm_fc_kernel, seq_len=T, masked=masked)

    out = pl.pallas_call(
        kernel,
        out_shape=jax.ShapeDtypeStruct((B_pad, O_pad), jnp.float32),
        grid_spec=pltpu.PrefetchScalarGridSpec(
            num_scalar_prefetch=0,
            grid=(T_pad // T_BLK,),
            in_specs=[
                pl.BlockSpec((T_BLK, B_pad, D), lambda t: (t, 0, 0)),  # x chunk
                pl.BlockSpec((D, 4 * H), lambda t: (0, 0)),            # W_ih^T
                pl.BlockSpec((H, 4 * H), lambda t: (0, 0)),            # W_hh^T
                pl.BlockSpec((1, 4 * H), lambda t: (0, 0)),            # bias
                pl.BlockSpec((H, O_pad), lambda t: (0, 0)),            # W_fc^T
                pl.BlockSpec((1, O_pad), lambda t: (0, 0)),            # b_fc
            ],
            out_specs=pl.BlockSpec((B_pad, O_pad), lambda t: (0, 0)),
            scratch_shapes=[
                pltpu.VMEM((B_pad, H), jnp.float32),   # h state
                pltpu.VMEM((B_pad, H), jnp.float32),   # c state
            ],
        ),
        compiler_params=pltpu.CompilerParams(
            dimension_semantics=("arbitrary",)),  # time axis is sequential
    )(x_tm, wih_t, whh_t, b_comb, wfc_t, bfc)

    return out[:B, :O]


def init_params(key, input_dim=32, hidden_dim=128, output_dim=26):
    ks = jax.random.split(key, 6)
    k = 1.0 / jnp.sqrt(hidden_dim)
    u = lambda kk, shape: jax.random.uniform(kk, shape, jnp.float32, -k, k)
    return {
        "w_ih": u(ks[0], (4 * hidden_dim, input_dim)),
        "w_hh": u(ks[1], (4 * hidden_dim, hidden_dim)),
        "b_ih": u(ks[2], (4 * hidden_dim,)),
        "b_hh": u(ks[3], (4 * hidden_dim,)),
        "w_fc": u(ks[4], (output_dim, hidden_dim)),
        "b_fc": u(ks[5], (output_dim,)),
    }


def reference_forward(x, params):
    """Pure-JAX reference matching nn.LSTM + nn.Linear semantics."""
    if x.ndim == 2:
        x = x[:, None, :]
    B, T, D = x.shape
    H = params["w_hh"].shape[1]
    h = jnp.zeros((B, H), jnp.float32)
    c = jnp.zeros((B, H), jnp.float32)
    b = params["b_ih"] + params["b_hh"]
    for t in range(T):
        gates = x[:, t, :] @ params["w_ih"].T + h @ params["w_hh"].T + b
        i = jax.nn.sigmoid(gates[:, 0:H])
        f = jax.nn.sigmoid(gates[:, H:2 * H])
        g = jnp.tanh(gates[:, 2 * H:3 * H])
        o = jax.nn.sigmoid(gates[:, 3 * H:4 * H])
        c = f * c + i * g
        h = o * jnp.tanh(c)
    return h @ params["w_fc"].T + params["b_fc"]


if __name__ == "__main__":
    key = jax.random.PRNGKey(0)
    kx, kp = jax.random.split(key)

    B, T, input_dim, hidden_dim, output_dim = 4, 8, 32, 128, 26
    x = jax.random.normal(kx, (B, T, input_dim), jnp.float32)
    params = init_params(kp, input_dim, hidden_dim, output_dim)

    ref = reference_forward(x, params)

    # f32 path: should match the reference tightly.
    out_f32 = jax.block_until_ready(lstm_model_forward(x, params))
    assert out_f32.shape == (B, output_dim)
    assert jnp.allclose(out_f32, ref, atol=1e-4, rtol=1e-4)

    # bf16-weight path (v6e/v7x MXU fast path); gate math stays f32, so only a
    # small drift vs the f32 reference is expected.
    out_bf16 = jax.block_until_ready(
        lstm_model_forward(x, params, weight_dtype=jnp.bfloat16))
    assert out_bf16.shape == (B, output_dim)
    assert jnp.allclose(out_bf16, ref, atol=1e-1, rtol=1e-1)

    print("KERNEL_OK")
</pallas_src>

<mosaic_0001>
module attributes {stable_mosaic.version = 11 : i64} {
  func.func @_lstm_fc_kernel(%arg0: i32, %arg1: memref<8x8x32xf32, #tpu.memory_space<vmem>>, %arg2: memref<32x512xf32, #tpu.memory_space<vmem>>, %arg3: memref<128x512xf32, #tpu.memory_space<vmem>>, %arg4: memref<1x512xf32, #tpu.memory_space<vmem>>, %arg5: memref<128x128xf32, #tpu.memory_space<vmem>>, %arg6: memref<1x128xf32, #tpu.memory_space<vmem>>, %arg7: memref<8x128xf32, #tpu.memory_space<vmem>>, %arg8: memref<8x128xf32, #tpu.memory_space<vmem>>, %arg9: memref<8x128xf32, #tpu.memory_space<vmem>>) attributes {dimension_semantics = [#tpu.dimension_semantics<arbitrary>], iteration_bounds = array<i64: 1>, scalar_prefetch = 0 : i64, scratch_operands = 2 : i64, tpu.core_type = #tpu.core_type<tc>, window_params = [{transform_indices = @transform_0, window_bounds = array<i64: 8, 8, 32>}, {pipeline_mode = #tpu.pipeline_mode<synchronous>, transform_indices = @transform_1, window_bounds = array<i64: 32, 512>}, {pipeline_mode = #tpu.pipeline_mode<synchronous>, transform_indices = @transform_2, window_bounds = array<i64: 128, 512>}, {pipeline_mode = #tpu.pipeline_mode<synchronous>, transform_indices = @transform_3, window_bounds = array<i64: 1, 512>}, {pipeline_mode = #tpu.pipeline_mode<synchronous>, transform_indices = @transform_4, window_bounds = array<i64: 128, 128>}, {pipeline_mode = #tpu.pipeline_mode<synchronous>, transform_indices = @transform_5, window_bounds = array<i64: 1, 128>}, {pipeline_mode = #tpu.pipeline_mode<synchronous>, transform_indices = @transform_6, window_bounds = array<i64: 8, 128>}]} {
    %c0_i32 = arith.constant 0 : i32
    %0 = arith.cmpi eq, %arg0, %c0_i32 : i32
    %1 = arith.extui %0 : i1 to i32
    %c0_i32_0 = arith.constant 0 : i32
    %2 = arith.cmpi ne, %1, %c0_i32_0 : i32
    scf.if %2 {
      %cst_65 = arith.constant 0.000000e+00 : f32
      %258 = vector.broadcast %cst_65 : f32 to vector<8x128xf32>
      %c0_66 = arith.constant 0 : index
      %c0_67 = arith.constant 0 : index
      %259 = vector.load %arg8[%c0_66, %c0_67] : memref<8x128xf32, #tpu.memory_space<vmem>>, vector<8x128xf32>
      tpu.vector_store %arg8[%c0_66, %c0_67], %258 {strides = array<i32>} : memref<8x128xf32, #tpu.memory_space<vmem>>, vector<8x128xf32>,
      %cst_68 = arith.constant 0.000000e+00 : f32
      %260 = vector.broadcast %cst_68 : f32 to vector<8x128xf32>
      %c0_69 = arith.constant 0 : index
      %c0_70 = arith.constant 0 : index
      %261 = vector.load %arg9[%c0_69, %c0_70] : memref<8x128xf32, #tpu.memory_space<vmem>>, vector<8x128xf32>
      tpu.vector_store %arg9[%c0_69, %c0_70], %260 {strides = array<i32>} : memref<8x128xf32, #tpu.memory_space<vmem>>, vector<8x128xf32>,
    } else {
    }
    %c0 = arith.constant 0 : index
    %c0_1 = arith.constant 0 : index
    %c0_2 = arith.constant 0 : index
    %3 = vector.load %arg1[%c0, %c0_1, %c0_2] : memref<8x8x32xf32, #tpu.memory_space<vmem>>, vector<8x8x32xf32>
    %4 = vector.shape_cast %3 : vector<8x8x32xf32> to vector<64x32xf32>
    %c0_3 = arith.constant 0 : index
    %c0_4 = arith.constant 0 : index
    %5 = vector.load %arg2[%c0_3, %c0_4] : memref<32x512xf32, #tpu.memory_space<vmem>>, vector<32x512xf32>
    %cst = arith.constant dense<0.000000e+00> : vector<64x512xf32>
    %6 = tpu.matmul %4, %5, %cst {dimension_numbers = #tpu.dot_dimension_numbers<[1], [0], [0], [1], [0, 0, 1, 1], [], []>} : vector<64x32xf32>, vector<32x512xf32>, vector<64x512xf32> -> vector<64x512xf32>
    %c0_5 = arith.constant 0 : index
    %c0_6 = arith.constant 0 : index
    %7 = vector.load %arg4[%c0_5, %c0_6] : memref<1x512xf32, #tpu.memory_space<vmem>>, vector<1x512xf32>
    %8 = vector.broadcast %7 : vector<1x512xf32> to vector<64x512xf32>
    %9 = arith.addf %6, %8 : vector<64x512xf32>
    %10 = vector.shape_cast %9 : vector<64x512xf32> to vector<8x8x512xf32>
    %c0_7 = arith.constant 0 : index
    %c0_8 = arith.constant 0 : index
    %11 = vector.load %arg8[%c0_7, %c0_8] : memref<8x128xf32, #tpu.memory_space<vmem>>, vector<8x128xf32>
    %c0_9 = arith.constant 0 : index
    %c0_10 = arith.constant 0 : index
    %12 = vector.load %arg9[%c0_9, %c0_10] : memref<8x128xf32, #tpu.memory_space<vmem>>, vector<8x128xf32>
    %13 = vector.extract_strided_slice %10 {offsets = [0, 0, 0], sizes = [1, 8, 512], strides = [1, 1, 1]} : vector<8x8x512xf32> to vector<1x8x512xf32>
    %14 = vector.shape_cast %13 : vector<1x8x512xf32> to vector<8x512xf32>
    %c0_11 = arith.constant 0 : index
    %c0_12 = arith.constant 0 : index
    %15 = vector.load %arg3[%c0_11, %c0_12] : memref<128x512xf32, #tpu.memory_space<vmem>>, vector<128x512xf32>
    %cst_13 = arith.constant dense<0.000000e+00> : vector<8x512xf32>
    %16 = tpu.matmul %11, %15, %cst_13 {dimension_numbers = #tpu.dot_dimension_numbers<[1], [0], [0], [1], [0, 0, 1, 1], [], []>} : vector<8x128xf32>, vector<128x512xf32>, vector<8x512xf32> -> vector<8x512xf32>
    %17 = arith.addf %14, %16 : vector<8x512xf32>
    %18 = vector.extract_strided_slice %17 {offsets = [0, 0], sizes = [8, 128], strides = [1, 1]} : vector<8x512xf32> to vector<8x128xf32>
    %19 = arith.negf %18 : vector<8x128xf32>
    %20 = math.exp %19 : vector<8x128xf32>
    %cst_14 = arith.constant 1.000000e+00 : f32
    %21 = vector.broadcast %cst_14 : f32 to vector<8x128xf32>
    %22 = arith.addf %21, %20 : vector<8x128xf32>
    %23 = arith.divf %21, %22 : vector<8x128xf32>
    %24 = vector.extract_strided_slice %17 {offsets = [0, 128], sizes = [8, 128], strides = [1, 1]} : vector<8x512xf32> to vector<8x128xf32>
    %25 = arith.negf %24 : vector<8x128xf32>
    %26 = math.exp %25 : vector<8x128xf32>
    %cst_15 = arith.constant 1.000000e+00 : f32
    %27 = vector.broadcast %cst_15 : f32 to vector<8x128xf32>
    %28 = arith.addf %27, %26 : vector<8x128xf32>
    %29 = arith.divf %27, %28 : vector<8x128xf32>
    %30 = vector.extract_strided_slice %17 {offsets = [0, 256], sizes = [8, 128], strides = [1, 1]} : vector<8x512xf32> to vector<8x128xf32>
    %31 = math.tanh %30 : vector<8x128xf32>
    %32 = vector.extract_strided_slice %17 {offsets = [0, 384], sizes = [8, 128], strides = [1, 1]} : vector<8x512xf32> to vector<8x128xf32>
    %33 = arith.negf %32 : vector<8x128xf32>
    %34 = math.exp %33 : vector<8x128xf32>
    %cst_16 = arith.constant 1.000000e+00 : f32
    %35 = vector.broadcast %cst_16 : f32 to vector<8x128xf32>
    %36 = arith.addf %35, %34 : vector<8x128xf32>
    %37 = arith.divf %35, %36 : vector<8x128xf32>
    %38 = arith.mulf %29, %12 : vector<8x128xf32>
    %39 = arith.mulf %23, %31 : vector<8x128xf32>
    %40 = arith.addf %38, %39 : vector<8x128xf32>
    %41 = math.tanh %40 : vector<8x128xf32>
    %42 = arith.mulf %37, %41 : vector<8x128xf32>
    %43 = vector.extract_strided_slice %10 {offsets = [1, 0, 0], sizes = [1, 8, 512], strides = [1, 1, 1]} : vector<8x8x512xf32> to vector<1x8x512xf32>
    %44 = vector.shape_cast %43 : vector<1x8x512xf32> to vector<8x512xf32>
    %c0_17 = arith.constant 0 : index
    %c0_18 = arith.constant 0 : index
    %45 = vector.load %arg3[%c0_17, %c0_18] : memref<128x512xf32, #tpu.memory_space<vmem>>, vector<128x512xf32>
    %cst_19 = arith.constant dense<0.000000e+00> : vector<8x512xf32>
    %46 = tpu.matmul %42, %45, %cst_19 {dimension_numbers = #tpu.dot_dimension_numbers<[1], [0], [0], [1], [0, 0, 1, 1], [], []>} : vector<8x128xf32>, vector<128x512xf32>, vector<8x512xf32> -> vector<8x512xf32>
    %47 = arith.addf %44, %46 : vector<8x512xf32>
    %48 = vector.extract_strided_slice %47 {offsets = [0, 0], sizes = [8, 128], strides = [1, 1]} : vector<8x512xf32> to vector<8x128xf32>
    %49 = arith.negf %48 : vector<8x128xf32>
    %50 = math.exp %49 : vector<8x128xf32>
    %cst_20 = arith.constant 1.000000e+00 : f32
    %51 = vector.broadcast %cst_20 : f32 to vector<8x128xf32>
    %52 = arith.addf %51, %50 : vector<8x128xf32>
    %53 = arith.divf %51, %52 : vector<8x128xf32>
    %54 = vector.extract_strided_slice %47 {offsets = [0, 128], sizes = [8, 128], strides = [1, 1]} : vector<8x512xf32> to vector<8x128xf32>
    %55 = arith.negf %54 : vector<8x128xf32>
    %56 = math.exp %55 : vector<8x128xf32>
    %cst_21 = arith.constant 1.000000e+00 : f32
    %57 = vector.broadcast %cst_21 : f32 to vector<8x128xf32>
    %58 = arith.addf %57, %56 : vector<8x128xf32>
    %59 = arith.divf %57, %58 : vector<8x128xf32>
    %60 = vector.extract_strided_slice %47 {offsets = [0, 256], sizes = [8, 128], strides = [1, 1]} : vector<8x512xf32> to vector<8x128xf32>
    %61 = math.tanh %60 : vector<8x128xf32>
    %62 = vector.extract_strided_slice %47 {offsets = [0, 384], sizes = [8, 128], strides = [1, 1]} : vector<8x512xf32> to vector<8x128xf32>
    %63 = arith.negf %62 : vector<8x128xf32>
    %64 = math.exp %63 : vector<8x128xf32>
    %cst_22 = arith.constant 1.000000e+00 : f32
    %65 = vector.broadcast %cst_22 : f32 to vector<8x128xf32>
    %66 = arith.addf %65, %64 : vector<8x128xf32>
    %67 = arith.divf %65, %66 : vector<8x128xf32>
    %68 = arith.mulf %59, %40 : vector<8x128xf32>
    %69 = arith.mulf %53, %61 : vector<8x128xf32>
    %70 = arith.addf %68, %69 : vector<8x128xf32>
    %71 = math.tanh %70 : vector<8x128xf32>
    %72 = arith.mulf %67, %71 : vector<8x128xf32>
    %73 = vector.extract_strided_slice %10 {offsets = [2, 0, 0], sizes = [1, 8, 512], strides = [1, 1, 1]} : vector<8x8x512xf32> to vector<1x8x512xf32>
    %74 = vector.shape_cast %73 : vector<1x8x512xf32> to vector<8x512xf32>
    %c0_23 = arith.constant 0 : index
    %c0_24 = arith.constant 0 : index
    %75 = vector.load %arg3[%c0_23, %c0_24] : memref<128x512xf32, #tpu.memory_space<vmem>>, vector<128x512xf32>
    %cst_25 = arith.constant dense<0.000000e+00> : vector<8x512xf32>
    %76 = tpu.matmul %72, %75, %cst_25 {dimension_numbers = #tpu.dot_dimension_numbers<[1], [0], [0], [1], [0, 0, 1, 1], [], []>} : vector<8x128xf32>, vector<128x512xf32>, vector<8x512xf32> -> vector<8x512xf32>
    %77 = arith.addf %74, %76 : vector<8x512xf32>
    %78 = vector.extract_strided_slice %77 {offsets = [0, 0], sizes = [8, 128], strides = [1, 1]} : vector<8x512xf32> to vector<8x128xf32>
    %79 = arith.negf %78 : vector<8x128xf32>
    %80 = math.exp %79 : vector<8x128xf32>
    %cst_26 = arith.constant 1.000000e+00 : f32
    %81 = vector.broadcast %cst_26 : f32 to vector<8x128xf32>
    %82 = arith.addf %81, %80 : vector<8x128xf32>
    %83 = arith.divf %81, %82 : vector<8x128xf32>
    %84 = vector.extract_strided_slice %77 {offsets = [0, 128], sizes = [8, 128], strides = [1, 1]} : vector<8x512xf32> to vector<8x128xf32>
    %85 = arith.negf %84 : vector<8x128xf32>
    %86 = math.exp %85 : vector<8x128xf32>
    %cst_27 = arith.constant 1.000000e+00 : f32
    %87 = vector.broadcast %cst_27 : f32 to vector<8x128xf32>
    %88 = arith.addf %87, %86 : vector<8x128xf32>
    %89 = arith.divf %87, %88 : vector<8x128xf32>
    %90 = vector.extract_strided_slice %77 {offsets = [0, 256], sizes = [8, 128], strides = [1, 1]} : vector<8x512xf32> to vector<8x128xf32>
    %91 = math.tanh %90 : vector<8x128xf32>
    %92 = vector.extract_strided_slice %77 {offsets = [0, 384], sizes = [8, 128], strides = [1, 1]} : vector<8x512xf32> to vector<8x128xf32>
    %93 = arith.negf %92 : vector<8x128xf32>
    %94 = math.exp %93 : vector<8x128xf32>
    %cst_28 = arith.constant 1.000000e+00 : f32
    %95 = vector.broadcast %cst_28 : f32 to vector<8x128xf32>
    %96 = arith.addf %95, %94 : vector<8x128xf32>
    %97 = arith.divf %95, %96 : vector<8x128xf32>
    %98 = arith.mulf %89, %70 : vector<8x128xf32>
    %99 = arith.mulf %83, %91 : vector<8x128xf32>
    %100 = arith.addf %98, %99 : vector<8x128xf32>
    %101 = math.tanh %100 : vector<8x128xf32>
    %102 = arith.mulf %97, %101 : vector<8x128xf32>
    %103 = vector.extract_strided_slice %10 {offsets = [3, 0, 0], sizes = [1, 8, 512], strides = [1, 1, 1]} : vector<8x8x512xf32> to vector<1x8x512xf32>
    %104 = vector.shape_cast %103 : vector<1x8x512xf32> to vector<8x512xf32>
    %c0_29 = arith.constant 0 : index
    %c0_30 = arith.constant 0 : index
    %105 = vector.load %arg3[%c0_29, %c0_30] : memref<128x512xf32, #tpu.memory_space<vmem>>, vector<128x512xf32>
    %cst_31 = arith.constant dense<0.000000e+00> : vector<8x512xf32>
    %106 = tpu.matmul %102, %105, %cst_31 {dimension_numbers = #tpu.dot_dimension_numbers<[1], [0], [0], [1], [0, 0, 1, 1], [], []>} : vector<8x128xf32>, vector<128x512xf32>, vector<8x512xf32> -> vector<8x512xf32>
    %107 = arith.addf %104, %106 : vector<8x512xf32>
    %108 = vector.extract_strided_slice %107 {offsets = [0, 0], sizes = [8, 128], strides = [1, 1]} : vector<8x512xf32> to vector<8x128xf32>
    %109 = arith.negf %108 : vector<8x128xf32>
    %110 = math.exp %109 : vector<8x128xf32>
    %cst_32 = arith.constant 1.000000e+00 : f32
    %111 = vector.broadcast %cst_32 : f32 to vector<8x128xf32>
    %112 = arith.addf %111, %110 : vector<8x128xf32>
    %113 = arith.divf %111, %112 : vector<8x128xf32>
    %114 = vector.extract_strided_slice %107 {offsets = [0, 128], sizes = [8, 128], strides = [1, 1]} : vector<8x512xf32> to vector<8x128xf32>
    %115 = arith.negf %114 : vector<8x128xf32>
    %116 = math.exp %115 : vector<8x128xf32>
    %cst_33 = arith.constant 1.000000e+00 : f32
    %117 = vector.broadcast %cst_33 : f32 to vector<8x128xf32>
    %118 = arith.addf %117, %116 : vector<8x128xf32>
    %119 = arith.divf %117, %118 : vector<8x128xf32>
    %120 = vector.extract_strided_slice %107 {offsets = [0, 256], sizes = [8, 128], strides = [1, 1]} : vector<8x512xf32> to vector<8x128xf32>
    %121 = math.tanh %120 : vector<8x128xf32>
    %122 = vector.extract_strided_slice %107 {offsets = [0, 384], sizes = [8, 128], strides = [1, 1]} : vector<8x512xf32> to vector<8x128xf32>
    %123 = arith.negf %122 : vector<8x128xf32>
    %124 = math.exp %123 : vector<8x128xf32>
    %cst_34 = arith.constant 1.000000e+00 : f32
    %125 = vector.broadcast %cst_34 : f32 to vector<8x128xf32>
    %126 = arith.addf %125, %124 : vector<8x128xf32>
    %127 = arith.divf %125, %126 : vector<8x128xf32>
    %128 = arith.mulf %119, %100 : vector<8x128xf32>
    %129 = arith.mulf %113, %121 : vector<8x128xf32>
    %130 = arith.addf %128, %129 : vector<8x128xf32>
    %131 = math.tanh %130 : vector<8x128xf32>
    %132 = arith.mulf %127, %131 : vector<8x128xf32>
    %133 = vector.extract_strided_slice %10 {offsets = [4, 0, 0], sizes = [1, 8, 512], strides = [1, 1, 1]} : vector<8x8x512xf32> to vector<1x8x512xf32>
    %134 = vector.shape_cast %133 : vector<1x8x512xf32> to vector<8x512xf32>
    %c0_35 = arith.constant 0 : index
    %c0_36 = arith.constant 0 : index
    %135 = vector.load %arg3[%c0_35, %c0_36] : memref<128x512xf32, #tpu.memory_space<vmem>>, vector<128x512xf32>
    %cst_37 = arith.constant dense<0.000000e+00> : vector<8x512xf32>
    %136 = tpu.matmul %132, %135, %cst_37 {dimension_numbers = #tpu.dot_dimension_numbers<[1], [0], [0], [1], [0, 0, 1, 1], [], []>} : vector<8x128xf32>, vector<128x512xf32>, vector<8x512xf32> -> vector<8x512xf32>
    %137 = arith.addf %134, %136 : vector<8x512xf32>
    %138 = vector.extract_strided_slice %137 {offsets = [0, 0], sizes = [8, 128], strides = [1, 1]} : vector<8x512xf32> to vector<8x128xf32>
    %139 = arith.negf %138 : vector<8x128xf32>
    %140 = math.exp %139 : vector<8x128xf32>
    %cst_38 = arith.constant 1.000000e+00 : f32
    %141 = vector.broadcast %cst_38 : f32 to vector<8x128xf32>
    %142 = arith.addf %141, %140 : vector<8x128xf32>
    %143 = arith.divf %141, %142 : vector<8x128xf32>
    %144 = vector.extract_strided_slice %137 {offsets = [0, 128], sizes = [8, 128], strides = [1, 1]} : vector<8x512xf32> to vector<8x128xf32>
    %145 = arith.negf %144 : vector<8x128xf32>
    %146 = math.exp %145 : vector<8x128xf32>
    %cst_39 = arith.constant 1.000000e+00 : f32
    %147 = vector.broadcast %cst_39 : f32 to vector<8x128xf32>
    %148 = arith.addf %147, %146 : vector<8x128xf32>
    %149 = arith.divf %147, %148 : vector<8x128xf32>
    %150 = vector.extract_strided_slice %137 {offsets = [0, 256], sizes = [8, 128], strides = [1, 1]} : vector<8x512xf32> to vector<8x128xf32>
    %151 = math.tanh %150 : vector<8x128xf32>
    %152 = vector.extract_strided_slice %137 {offsets = [0, 384], sizes = [8, 128], strides = [1, 1]} : vector<8x512xf32> to vector<8x128xf32>
    %153 = arith.negf %152 : vector<8x128xf32>
    %154 = math.exp %153 : vector<8x128xf32>
    %cst_40 = arith.constant 1.000000e+00 : f32
    %155 = vector.broadcast %cst_40 : f32 to vector<8x128xf32>
    %156 = arith.addf %155, %154 : vector<8x128xf32>
    %157 = arith.divf %155, %156 : vector<8x128xf32>
    %158 = arith.mulf %149, %130 : vector<8x128xf32>
    %159 = arith.mulf %143, %151 : vector<8x128xf32>
    %160 = arith.addf %158, %159 : vector<8x128xf32>
    %161 = math.tanh %160 : vector<8x128xf32>
    %162 = arith.mulf %157, %161 : vector<8x128xf32>
    %163 = vector.extract_strided_slice %10 {offsets = [5, 0, 0], sizes = [1, 8, 512], strides = [1, 1, 1]} : vector<8x8x512xf32> to vector<1x8x512xf32>
    %164 = vector.shape_cast %163 : vector<1x8x512xf32> to vector<8x512xf32>
    %c0_41 = arith.constant 0 : index
    %c0_42 = arith.constant 0 : index
    %165 = vector.load %arg3[%c0_41, %c0_42] : memref<128x512xf32, #tpu.memory_space<vmem>>, vector<128x512xf32>
    %cst_43 = arith.constant dense<0.000000e+00> : vector<8x512xf32>
    %166 = tpu.matmul %162, %165, %cst_43 {dimension_numbers = #tpu.dot_dimension_numbers<[1], [0], [0], [1], [0, 0, 1, 1], [], []>} : vector<8x128xf32>, vector<128x512xf32>, vector<8x512xf32> -> vector<8x512xf32>
    %167 = arith.addf %164, %166 : vector<8x512xf32>
    %168 = vector.extract_strided_slice %167 {offsets = [0, 0], sizes = [8, 128], strides = [1, 1]} : vector<8x512xf32> to vector<8x128xf32>
    %169 = arith.negf %168 : vector<8x128xf32>
    %170 = math.exp %169 : vector<8x128xf32>
    %cst_44 = arith.constant 1.000000e+00 : f32
    %171 = vector.broadcast %cst_44 : f32 to vector<8x128xf32>
    %172 = arith.addf %171, %170 : vector<8x128xf32>
    %173 = arith.divf %171, %172 : vector<8x128xf32>
    %174 = vector.extract_strided_slice %167 {offsets = [0, 128], sizes = [8, 128], strides = [1, 1]} : vector<8x512xf32> to vector<8x128xf32>
    %175 = arith.negf %174 : vector<8x128xf32>
    %176 = math.exp %175 : vector<8x128xf32>
    %cst_45 = arith.constant 1.000000e+00 : f32
    %177 = vector.broadcast %cst_45 : f32 to vector<8x128xf32>
    %178 = arith.addf %177, %176 : vector<8x128xf32>
    %179 = arith.divf %177, %178 : vector<8x128xf32>
    %180 = vector.extract_strided_slice %167 {offsets = [0, 256], sizes = [8, 128], strides = [1, 1]} : vector<8x512xf32> to vector<8x128xf32>
    %181 = math.tanh %180 : vector<8x128xf32>
    %182 = vector.extract_strided_slice %167 {offsets = [0, 384], sizes = [8, 128], strides = [1, 1]} : vector<8x512xf32> to vector<8x128xf32>
    %183 = arith.negf %182 : vector<8x128xf32>
    %184 = math.exp %183 : vector<8x128xf32>
    %cst_46 = arith.constant 1.000000e+00 : f32
    %185 = vector.broadcast %cst_46 : f32 to vector<8x128xf32>
    %186 = arith.addf %185, %184 : vector<8x128xf32>
    %187 = arith.divf %185, %186 : vector<8x128xf32>
    %188 = arith.mulf %179, %160 : vector<8x128xf32>
    %189 = arith.mulf %173, %181 : vector<8x128xf32>
    %190 = arith.addf %188, %189 : vector<8x128xf32>
    %191 = math.tanh %190 : vector<8x128xf32>
    %192 = arith.mulf %187, %191 : vector<8x128xf32>
    %193 = vector.extract_strided_slice %10 {offsets = [6, 0, 0], sizes = [1, 8, 512], strides = [1, 1, 1]} : vector<8x8x512xf32> to vector<1x8x512xf32>
    %194 = vector.shape_cast %193 : vector<1x8x512xf32> to vector<8x512xf32>
    %c0_47 = arith.constant 0 : index
    %c0_48 = arith.constant 0 : index
    %195 = vector.load %arg3[%c0_47, %c0_48] : memref<128x512xf32, #tpu.memory_space<vmem>>, vector<128x512xf32>
    %cst_49 = arith.constant dense<0.000000e+00> : vector<8x512xf32>
    %196 = tpu.matmul %192, %195, %cst_49 {dimension_numbers = #tpu.dot_dimension_numbers<[1], [0], [0], [1], [0, 0, 1, 1], [], []>} : vector<8x128xf32>, vector<128x512xf32>, vector<8x512xf32> -> vector<8x512xf32>
    %197 = arith.addf %194, %196 : vector<8x512xf32>
    %198 = vector.extract_strided_slice %197 {offsets = [0, 0], sizes = [8, 128], strides = [1, 1]} : vector<8x512xf32> to vector<8x128xf32>
    %199 = arith.negf %198 : vector<8x128xf32>
    %200 = math.exp %199 : vector<8x128xf32>
    %cst_50 = arith.constant 1.000000e+00 : f32
    %201 = vector.broadcast %cst_50 : f32 to vector<8x128xf32>
    %202 = arith.addf %201, %200 : vector<8x128xf32>
    %203 = arith.divf %201, %202 : vector<8x128xf32>
    %204 = vector.extract_strided_slice %197 {offsets = [0, 128], sizes = [8, 128], strides = [1, 1]} : vector<8x512xf32> to vector<8x128xf32>
    %205 = arith.negf %204 : vector<8x128xf32>
    %206 = math.exp %205 : vector<8x128xf32>
    %cst_51 = arith.constant 1.000000e+00 : f32
    %207 = vector.broadcast %cst_51 : f32 to vector<8x128xf32>
    %208 = arith.addf %207, %206 : vector<8x128xf32>
    %209 = arith.divf %207, %208 : vector<8x128xf32>
    %210 = vector.extract_strided_slice %197 {offsets = [0, 256], sizes = [8, 128], strides = [1, 1]} : vector<8x512xf32> to vector<8x128xf32>
    %211 = math.tanh %210 : vector<8x128xf32>
    %212 = vector.extract_strided_slice %197 {offsets = [0, 384], sizes = [8, 128], strides = [1, 1]} : vector<8x512xf32> to vector<8x128xf32>
    %213 = arith.negf %212 : vector<8x128xf32>
    %214 = math.exp %213 : vector<8x128xf32>
    %cst_52 = arith.constant 1.000000e+00 : f32
    %215 = vector.broadcast %cst_52 : f32 to vector<8x128xf32>
    %216 = arith.addf %215, %214 : vector<8x128xf32>
    %217 = arith.divf %215, %216 : vector<8x128xf32>
    %218 = arith.mulf %209, %190 : vector<8x128xf32>
    %219 = arith.mulf %203, %211 : vector<8x128xf32>
    %220 = arith.addf %218, %219 : vector<8x128xf32>
    %221 = math.tanh %220 : vector<8x128xf32>
    %222 = arith.mulf %217, %221 : vector<8x128xf32>
    %223 = vector.extract_strided_slice %10 {offsets = [7, 0, 0], sizes = [1, 8, 512], strides = [1, 1, 1]} : vector<8x8x512xf32> to vector<1x8x512xf32>
    %224 = vector.shape_cast %223 : vector<1x8x512xf32> to vector<8x512xf32>
    %c0_53 = arith.constant 0 : index
    %c0_54 = arith.constant 0 : index
    %225 = vector.load %arg3[%c0_53, %c0_54] : memref<128x512xf32, #tpu.memory_space<vmem>>, vector<128x512xf32>
    %cst_55 = arith.constant dense<0.000000e+00> : vector<8x512xf32>
    %226 = tpu.matmul %222, %225, %cst_55 {dimension_numbers = #tpu.dot_dimension_numbers<[1], [0], [0], [1], [0, 0, 1, 1], [], []>} : vector<8x128xf32>, vector<128x512xf32>, vector<8x512xf32> -> vector<8x512xf32>
    %227 = arith.addf %224, %226 : vector<8x512xf32>
    %228 = vector.extract_strided_slice %227 {offsets = [0, 0], sizes = [8, 128], strides = [1, 1]} : vector<8x512xf32> to vector<8x128xf32>
    %229 = arith.negf %228 : vector<8x128xf32>
    %230 = math.exp %229 : vector<8x128xf32>
    %cst_56 = arith.constant 1.000000e+00 : f32
    %231 = vector.broadcast %cst_56 : f32 to vector<8x128xf32>
    %232 = arith.addf %231, %230 : vector<8x128xf32>
    %233 = arith.divf %231, %232 : vector<8x128xf32>
    %234 = vector.extract_strided_slice %227 {offsets = [0, 128], sizes = [8, 128], strides = [1, 1]} : vector<8x512xf32> to vector<8x128xf32>
    %235 = arith.negf %234 : vector<8x128xf32>
    %236 = math.exp %235 : vector<8x128xf32>
    %cst_57 = arith.constant 1.000000e+00 : f32
    %237 = vector.broadcast %cst_57 : f32 to vector<8x128xf32>
    %238 = arith.addf %237, %236 : vector<8x128xf32>
    %239 = arith.divf %237, %238 : vector<8x128xf32>
    %240 = vector.extract_strided_slice %227 {offsets = [0, 256], sizes = [8, 128], strides = [1, 1]} : vector<8x512xf32> to vector<8x128xf32>
    %241 = math.tanh %240 : vector<8x128xf32>
    %242 = vector.extract_strided_slice %227 {offsets = [0, 384], sizes = [8, 128], strides = [1, 1]} : vector<8x512xf32> to vector<8x128xf32>
    %243 = arith.negf %242 : vector<8x128xf32>
    %244 = math.exp %243 : vector<8x128xf32>
    %cst_58 = arith.constant 1.000000e+00 : f32
    %245 = vector.broadcast %cst_58 : f32 to vector<8x128xf32>
    %246 = arith.addf %245, %244 : vector<8x128xf32>
    %247 = arith.divf %245, %246 : vector<8x128xf32>
    %248 = arith.mulf %239, %220 : vector<8x128xf32>
    %249 = arith.mulf %233, %241 : vector<8x128xf32>
    %250 = arith.addf %248, %249 : vector<8x128xf32>
    %251 = math.tanh %250 : vector<8x128xf32>
    %252 = arith.mulf %247, %251 : vector<8x128xf32>
    %c0_59 = arith.constant 0 : index
    %c0_60 = arith.constant 0 : index
    %253 = vector.load %arg8[%c0_59, %c0_60] : memref<8x128xf32, #tpu.memory_space<vmem>>, vector<8x128xf32>
    tpu.vector_store %arg8[%c0_59, %c0_60], %252 {strides = array<i32>} : memref<8x128xf32, #tpu.memory_space<vmem>>, vector<8x128xf32>,
    %c0_61 = arith.constant 0 : index
    %c0_62 = arith.constant 0 : index
    %254 = vector.load %arg9[%c0_61, %c0_62] : memref<8x128xf32, #tpu.memory_space<vmem>>, vector<8x128xf32>
    tpu.vector_store %arg9[%c0_61, %c0_62], %250 {strides = array<i32>} : memref<8x128xf32, #tpu.memory_space<vmem>>, vector<8x128xf32>,
    %c0_i32_63 = arith.constant 0 : i32
    %255 = arith.cmpi eq, %arg0, %c0_i32_63 : i32
    %256 = arith.extui %255 : i1 to i32
    %c0_i32_64 = arith.constant 0 : i32
    %257 = arith.cmpi ne, %256, %c0_i32_64 : i32
    scf.if %257 {
      %c0_65 = arith.constant 0 : index
      %c0_66 = arith.constant 0 : index
      %258 = vector.load %arg5[%c0_65, %c0_66] : memref<128x128xf32, #tpu.memory_space<vmem>>, vector<128x128xf32>
      %cst_67 = arith.constant dense<0.000000e+00> : vector<8x128xf32>
      %259 = tpu.matmul %252, %258, %cst_67 {dimension_numbers = #tpu.dot_dimension_numbers<[1], [0], [0], [1], [0, 0, 1, 1], [], []>} : vector<8x128xf32>, vector<128x128xf32>, vector<8x128xf32> -> vector<8x128xf32>
      %c0_68 = arith.constant 0 : index
      %c0_69 = arith.constant 0 : index
      %260 = vector.load %arg6[%c0_68, %c0_69] : memref<1x128xf32, #tpu.memory_space<vmem>>, vector<1x128xf32>
      %261 = vector.broadcast %260 : vector<1x128xf32> to vector<8x128xf32>
      %262 = arith.addf %259, %261 : vector<8x128xf32>
      %c0_70 = arith.constant 0 : index
      %c0_71 = arith.constant 0 : index
      %263 = vector.load %arg7[%c0_70, %c0_71] : memref<8x128xf32, #tpu.memory_space<vmem>>, vector<8x128xf32>
      tpu.vector_store %arg7[%c0_70, %c0_71], %262 {strides = array<i32>} : memref<8x128xf32, #tpu.memory_space<vmem>>, vector<8x128xf32>,
    } else {
    }
    return
  }
  func.func @transform_0(%arg0: i32) -> (i32, i32, i32) {
    %c0_i32 = arith.constant 0 : i32
    %c0_i32_0 = arith.constant 0 : i32
    %c0_i32_1 = arith.constant 0 : i32
    return %arg0, %c0_i32, %c0_i32_0 : i32, i32, i32
  }
  func.func @transform_1(%arg0: i32) -> (i32, i32) {
    %c0_i32 = arith.constant 0 : i32
    %c0_i32_0 = arith.constant 0 : i32
    %c0_i32_1 = arith.constant 0 : i32
    return %c0_i32, %c0_i32_0 : i32, i32
  }
  func.func @transform_2(%arg0: i32) -> (i32, i32) {
    %c0_i32 = arith.constant 0 : i32
    %c0_i32_0 = arith.constant 0 : i32
    %c0_i32_1 = arith.constant 0 : i32
    return %c0_i32, %c0_i32_0 : i32, i32
  }
  func.func @transform_3(%arg0: i32) -> (i32, i32) {
    %c0_i32 = arith.constant 0 : i32
    %c0_i32_0 = arith.constant 0 : i32
    %c0_i32_1 = arith.constant 0 : i32
    return %c0_i32, %c0_i32_0 : i32, i32
  }
  func.func @transform_4(%arg0: i32) -> (i32, i32) {
    %c0_i32 = arith.constant 0 : i32
    %c0_i32_0 = arith.constant 0 : i32
    %c0_i32_1 = arith.constant 0 : i32
    return %c0_i32, %c0_i32_0 : i32, i32
  }
  func.func @transform_5(%arg0: i32) -> (i32, i32) {
    %c0_i32 = arith.constant 0 : i32
    %c0_i32_0 = arith.constant 0 : i32
    %c0_i32_1 = arith.constant 0 : i32
    return %c0_i32, %c0_i32_0 : i32, i32
  }
  func.func @transform_6(%arg0: i32) -> (i32, i32) {
    %c0_i32 = arith.constant 0 : i32
    %c0_i32_0 = arith.constant 0 : i32
    %c0_i32_1 = arith.constant 0 : i32
    return %c0_i32, %c0_i32_0 : i32, i32
  }
}

</mosaic_0001>

<bundles_post_ra>
// kernel: tpu_custom_call.1
= control target key start
LH: loop header
LB: loop body
LE: loop exit
PB: predicated region body
PF: predicated region fallthrough
CT: control target
= control target key end

     0   :  { %11 = vsyncpa [#allocation5], 0  ;;  %s3077_s0 = inlined_call_operand.hbm [shape: f32[8,8,32], index: 0, kind: input, shape index: {}]   ;;  %s3078_s1 = inlined_call_operand.hbm [shape: f32[32,512], index: 1, kind: input, shape index: {}]   ;;  %s3079_s2 = inlined_call_operand.hbm [shape: f32[128,512], index: 2, kind: input, shape index: {}]   ;;  %s3080_s3 = inlined_call_operand.hbm [shape: f32[1,512], index: 3, kind: input, shape index: {}]   ;;  %s3081_s4 = inlined_call_operand.hbm [shape: f32[128,128], index: 4, kind: input, shape index: {}]   ;;  %s3082_s5 = inlined_call_operand.vmem [shape: f32[1,128], index: 5, kind: input, shape index: {}]   ;;  %s3083_s6 = inlined_call_operand.hbm [shape: f32[8,128], index: 6, kind: output, shape index: {}]  }
   0x1   :  { %12 = vsyncpa [#allocation8], 0 }
   0x2   :  { %13 = vsyncpa [#allocation11], 0  ;;  %s32_s23 = sshll.u32 %s3078_s1, 4  ;;  %s33_s23 = int_to_ptr.hbm [resolvable:$true] %s32_s23 }
   0x3   :  { %14 = vsyncpa [#allocation6], 0  ;;  %s2060_s24 = smov [#allocation7]   ;;  %s59_s28 = sshll.u32 %s3080_s3, 4  ;;  %s60_s28 = int_to_ptr.hbm [resolvable:$true] %s59_s28 }
   0x4   :  { %s34_s25 = sshll.u32 %s2060_s24, 4  ;;  %s2061_s29 = smov 512   ;;  %s35_s25 = int_to_ptr.vmem [resolvable:$true] %s34_s25 }
   0x5   :  { %s2062_s30 = smov 32   ;;  %s2063_s7 = smov [#allocation10]  }
   0x6   :  { %40 = dma.hbm_to_vmem [thread:$0]  %s33_s23, 2048, %s35_s25, [#allocation8], %s2061_s29, %s2061_s29, %s2062_s30  }
   0x7   :  { %s61_s8 = sshll.u32 %s2063_s7, 4  ;;  %s19_s11 = sshll.u32 %s3077_s0, 4  ;;  %s62_s8 = int_to_ptr.vmem [resolvable:$true] %s61_s8  ;;  %s20_s11 = int_to_ptr.hbm [resolvable:$true] %s19_s11 }
   0x8   :  { %64 = dma.hbm_to_vmem [thread:$0]  %s60_s28, 64, %s62_s8, [#allocation11]  }
   0x9   :  { %s2064_s1 = smov [#allocation4]   ;;  %s45_s3 = sshll.u32 %s3079_s2, 4  ;;  %s46_s3 = int_to_ptr.hbm [resolvable:$true] %s45_s3 }
   0xa   :  { %s21_s12 = sshll.u32 %s2064_s1, 4  ;;  %s2065_s15 = smov 128   ;;  %s22_s12 = int_to_ptr.vmem [resolvable:$true] %s21_s12 }
   0xb   :  { %s2066_s16 = smov 8   ;;  %s2067_s17 = smov [#allocation9]  }
   0xc   :  { %27 = dma.hbm_to_vmem [thread:$0]  %s20_s11, 1024, %s22_s12, [#allocation5], %s2065_s15, %s2065_s15, %s2066_s16  }
   0xd   :  { %s47_s18 = sshll.u32 %s2067_s17, 4  ;;  %s69_s0 = sshll.u32 %s3081_s4, 4  ;;  %s48_s18 = int_to_ptr.vmem [resolvable:$true] %s47_s18  ;;  %s70_s0 = int_to_ptr.hbm [resolvable:$true] %s69_s0 }
   0xe   :  { %53 = dma.hbm_to_vmem [thread:$0]  %s46_s3, 8192, %s48_s18, [#allocation8], %s2061_s29, %s2061_s29, %s2062_s30  }
   0xf   :  { %s2068_s21 = smov [#allocation12]  }
  0x10   :  { %s71_s22 = sshll.u32 %s2068_s21, 4  ;;  %s72_s22 = int_to_ptr.vmem [resolvable:$true] %s71_s22 }
  0x11   :  { %77 = dma.hbm_to_vmem [thread:$0]  %s70_s0, 2048, %s72_s22, [#allocation11], %s2065_s15, %s2065_s15, %s2066_s16  }
  0x12   :  { %2052 = dma.done.wait [#allocation5], 1024  }
  0x13   :  { %2053 = vsyncadd [#allocation5], 4294966272 }
  0x14   :  { %2054 = dma.done.wait [#allocation8], 10240  }
  0x15   :  { %2055 = vsyncadd [#allocation8], 4294957056 }
  0x16   :  { %2056 = dma.done.wait [#allocation11], 2112  }
  0x17   :  { %2057 = vsyncadd [#allocation11], 4294965184  ;;  %v126_v0 = vld [vmem:[#allocation7 + $0x60] sm:$0xff]  ;;  %vm140_vm0 = vcmask 261120   ;;  %v2121_v5 = vld [vmem:[#allocation4 + $0x28] sm:$0xff]  ;;  %s2070_s23 = smov [#allocation13]  }
  0x18   :  { %v122_v1 = vld [vmem:[#allocation7 + $0x40] sm:$0xff]  ;;  %177 = vmatpush.msra.mxu0 %v126_v0  ;;  %1692 = vmatpush.msra.mxu1 %v126_v0  ;;  %v2123_v6 = vld [vmem:[#allocation4 + $0x30] sm:$0xff]  ;;  %v2125_v7 = vld [vmem:[#allocation4 + $0x38] sm:$0xff]  ;;  %s1622_s24 = sshll.u32 %s2070_s23, 4  ;;  %s1624_s27 = sshll.u32 %s3083_s6, 4  ;;  %s1623_s24 = int_to_ptr.vmem [resolvable:$true] %s1622_s24  ;;  %s1625_s27 = int_to_ptr.hbm [resolvable:$true] %s1624_s27 }
  0x19   :  { %1693 = vmatpush.msra.mxu2 %v126_v0  ;;  %1694 = vmatpush.msra.mxu3 %v126_v0  ;;  %v118_v2 = vld [vmem:[#allocation7 + $0x20] sm:$0xff]  ;;  %v127_v8 = vld [vmem:[#allocation7 + $0x68] sm:$0xff]  ;;  %v128_v9 = vld [vmem:[#allocation7 + $0x70] sm:$0xff] }
  0x1a   :  { %178 = vmatpush.msra.mxu0 %v122_v1  ;;  %1695 = vmatpush.msra.mxu1 %v122_v1  ;;  %v114_v3 = vld [vmem:[#allocation7] sm:$0xff]  ;;  %v129_v10 = vld [vmem:[#allocation7 + $0x78] sm:$0xff]  ;;  %v123_v12 = vld [vmem:[#allocation7 + $0x48] sm:$0xff] }
  0x1b   :  { %1696 = vmatpush.msra.mxu2 %v122_v1  ;;  %1697 = vmatpush.msra.mxu3 %v122_v1  ;;  %v106_v4 = vld [vmem:[#allocation4] sm:$0xff]  ;;  %v124_v13 = vld [vmem:[#allocation7 + $0x50] sm:$0xff]  ;;  %v125_v14 = vld [vmem:[#allocation7 + $0x58] sm:$0xff] }
  0x1c   :  { %179 = vmatpush.msra.mxu0 %v118_v2  ;;  %1698 = vmatpush.msra.mxu1 %v118_v2  ;;  %v2130_v11 = vld [vmem:[#allocation9 + $0x1e0] sm:$0xff]  ;;  %v119_v16 = vld [vmem:[#allocation7 + $0x28] sm:$0xff]  ;;  %v120_v17 = vld [vmem:[#allocation7 + $0x30] sm:$0xff] }
  0x1d   :  { %1699 = vmatpush.msra.mxu2 %v118_v2  ;;  %1700 = vmatpush.msra.mxu3 %v118_v2  ;;  %3184 = vst [vmem:[#allocation18_spill] sm:$0xff] %v2130_v11  ;;  %v2136_v15 = vld [vmem:[#allocation9 + $0x1c0] sm:$0xff]  ;;  %v121_v18 = vld [vmem:[#allocation7 + $0x38] sm:$0xff]  ;;  %v115_v20 = vld [vmem:[#allocation7 + $0x8] sm:$0xff] }
  0x1e   :  { %180 = vmatpush.msra.mxu0 %v114_v3  ;;  %1701 = vmatpush.msra.mxu1 %v114_v3  ;;  %v2139_v19 = vld [vmem:[#allocation9 + $0x1a0] sm:$0xff]  ;;  %v116_v21 = vld [vmem:[#allocation7 + $0x10] sm:$0xff]  ;;  %v117_v22 = vld [vmem:[#allocation7 + $0x18] sm:$0xff] }
  0x1f   :  { %1702 = vmatpush.msra.mxu2 %v114_v3  ;;  %1703 = vmatpush.msra.mxu3 %v114_v3  ;;  %v107_v23 = vld [vmem:[#allocation4 + $0x8] sm:$0xff]  ;;  %v2146_v25 = vld [vmem:[#allocation9 + $0x1f8] sm:$0xff]  ;;  %v2148_v26 = vld [vmem:[#allocation9 + $0x180] sm:$0xff] }
  0x20   :  { %1636 = vmatmul.msk.f32.vlgmr.msra.gmra.mxu0 %vm140_vm0, %v106_v4  ;;  %1641 = vmatmul.msk.f32.vlgmr.msra.gmra.mxu1 %vm140_vm0, %v2121_v5  ;;  %v2143_v24 = vld [vmem:[#allocation9 + $0x1e8] sm:$0xff]  ;;  %v2154_v28 = vld [vmem:[#allocation9 + $0x1f0] sm:$0xff]  ;;  %v2158_v29 = vld [vmem:[#allocation9 + $0x160] sm:$0xff] }
  0x21   :  { %1642 = vmatmul.msk.f32.vlgmr.msra.gmra.mxu2 %vm140_vm0, %v2123_v6  ;;  %1643 = vmatmul.msk.f32.vlgmr.msra.gmra.mxu3 %vm140_vm0, %v2125_v7  ;;  %v2152_v27 = vld [vmem:[#allocation9 + $0x1c8] sm:$0xff]  ;;  %v2160_v30 = vld [vmem:[#allocation9 + $0x1d8] sm:$0xff]  ;;  %v2166_v32 = vld [vmem:[#allocation9 + $0x1d0] sm:$0xff] }
  0x22   :  { %218 = vmatpush.msrb.mxu1 %v127_v8  ;;  %259 = vmatpush.msrb.mxu2 %v128_v9  ;;  %v2164_v31 = vld [vmem:[#allocation9 + $0x1a8] sm:$0xff]  ;;  %v2169_v33 = vld [vmem:[#allocation9 + $0x140] sm:$0xff]  ;;  %v2171_v34 = vld [vmem:[#allocation9 + $0x1b8] sm:$0xff] }
  0x23   :  { %300 = vmatpush.msrb.mxu3 %v129_v10  ;;  %395 = vmatpush.msrb.mxu0 %v2130_v11  ;;  %v108_v35 = vld [vmem:[#allocation4 + $0x10] sm:$0xff]  ;;  %v2176_v36 = vld [vmem:[#allocation9 + $0x188] sm:$0xff]  ;;  %v2181_v37 = vld [vmem:[#allocation9 + $0x120] sm:$0xff] }
  0x24   :  { %219 = vmatpush.msrb.mxu1 %v123_v12  ;;  %260 = vmatpush.msrb.mxu2 %v124_v13  ;;  %v2186_v38 = vld [vmem:[#allocation9 + $0x168] sm:$0xff]  ;;  %v2188_v39 = vld [vmem:[#allocation9 + $0x198] sm:$0xff]  ;;  %v2192_v40 = vld [vmem:[#allocation9 + $0x100] sm:$0xff] }
  0x25   :  { %301 = vmatpush.msrb.mxu3 %v125_v14  ;;  %396 = vmatpush.msrb.mxu0 %v2136_v15  ;;  %v2194_v41 = vld [vmem:[#allocation9 + $0x1b0] sm:$0xff]  ;;  %v2198_v42 = vld [vmem:[#allocation9 + $0x148] sm:$0xff]  ;;  %v2200_v43 = vld [vmem:[#allocation9 + $0x178] sm:$0xff] }
  0x26   :  { %220 = vmatpush.msrb.mxu1 %v119_v16  ;;  %261 = vmatpush.msrb.mxu2 %v120_v17  ;;  %v2203_v44 = vld [vmem:[#allocation9 + $0xe0] sm:$0xff]  ;;  %v2206_v45 = vld [vmem:[#allocation9 + $0x190] sm:$0xff]  ;;  %v2210_v46 = vld [vmem:[#allocation9 + $0x128] sm:$0xff] }
  0x27   :  { %302 = vmatpush.msrb.mxu3 %v121_v18  ;;  %397 = vmatpush.msrb.mxu0 %v2139_v19  ;;  %v2212_v47 = vld [vmem:[#allocation9 + $0x158] sm:$0xff]  ;;  %v2216_v49 = vld [vmem:[#allocation9 + $0x170] sm:$0xff]  ;;  %v2220_v50 = vld [vmem:[#allocation9 + $0xc0] sm:$0xff] }
  0x28   :  { %221 = vmatpush.msrb.mxu1 %v115_v20  ;;  %262 = vmatpush.msrb.mxu2 %v116_v21  ;;  %v109_v48 = vld [vmem:[#allocation4 + $0x18] sm:$0xff]  ;;  %v2225_v51 = vld [vmem:[#allocation9 + $0x108] sm:$0xff]  ;;  %v2232_v53 = vld [vmem:[#allocation9 + $0xa0] sm:$0xff]  ;;  %v3086_v21 = vmov 0.0  }
  0x29   :  { %303 = vmatpush.msrb.mxu3 %v117_v22  ;;  %1637 = vmatmul.msk.f32.gmra.mxu0 %vm140_vm0, %v107_v23  ;;  %v2227_v52 = vld [vmem:[#allocation9 + $0x138] sm:$0xff]  ;;  %3185 = vst [vmem:[#allocation19_spill] sm:$0xff] %v2232_v53  ;;  %v2234_v54 = vld [vmem:[#allocation9 + $0x150] sm:$0xff]  ;;  %v2238_v55 = vld [vmem:[#allocation9 + $0xe8] sm:$0xff] }
  0x2a   :  { %1644 = vmatmul.msk.f32.vlgmr.msrb.gmra.mxu1 %vm140_vm0, %v106_v4  ;;  %1652 = vmatmul.msk.f32.vlgmr.msrb.gmra.mxu2 %vm140_vm0, %v106_v4  ;;  %v2240_v56 = vld [vmem:[#allocation9 + $0x118] sm:$0xff]  ;;  %v2242_v57 = vld [vmem:[#allocation9 + $0x80] sm:$0xff]  ;;  %v2246_v58 = vld [vmem:[#allocation9 + $0x130] sm:$0xff] }
  0x2b   :  { %1660 = vmatmul.msk.f32.vlgmr.msrb.gmra.mxu3 %vm140_vm0, %v106_v4  ;;  %415 = vmatpush.msra.mxu1 %v2143_v24  ;;  %3186 = vst [vmem:[#allocation20_spill] sm:$0xff] %v2242_v57  ;;  %v2250_v59 = vld [vmem:[#allocation9 + $0xc8] sm:$0xff]  ;;  %v2252_v60 = vld [vmem:[#allocation9 + $0xf8] sm:$0xff]  ;;  %v110_v61 = vld [vmem:[#allocation4 + $0x20] sm:$0xff] }
  0x2c   :  { %455 = vmatpush.msra.mxu3 %v2146_v25  ;;  %398 = vmatpush.msrb.mxu0 %v2148_v26  ;;  %v2256_v62 = vld [vmem:[#allocation9 + $0x110] sm:$0xff]  ;;  %v2260_v63 = vld [vmem:[#allocation9 + $0x60] sm:$0xff]  ;;  %v2265_v0 = vld [vmem:[#allocation9 + $0xa8] sm:$0xff] }
  0x2d   :  { %416 = vmatpush.msra.mxu1 %v2152_v27  ;;  %435 = vmatpush.msra.mxu2 %v2154_v28  ;;  %3187 = vst [vmem:[#allocation21_spill] sm:$0xff] %v2260_v63  ;;  %v2267_v1 = vld [vmem:[#allocation9 + $0xd8] sm:$0xff]  ;;  %v2272_v2 = vld [vmem:[#allocation9 + $0x40] sm:$0xff]  ;;  %v2274_v3 = vld [vmem:[#allocation9 + $0xf0] sm:$0xff] }
  0x2e   :  { %399 = vmatpush.msrb.mxu0 %v2158_v29  ;;  %456 = vmatpush.msra.mxu3 %v2160_v30  ;;  %3188 = vst [vmem:[#allocation22_spill] sm:$0xff] %v2265_v0  ;;  %v2278_v4 = vld [vmem:[#allocation9 + $0x88] sm:$0xff]  ;;  %v2280_v8 = vld [vmem:[#allocation9 + $0xb8] sm:$0xff]  ;;  %v2282_v9 = vld [vmem:[#allocation9 + $0x20] sm:$0xff] }
  0x2f   :  { %417 = vmatpush.msra.mxu1 %v2164_v31  ;;  %436 = vmatpush.msra.mxu2 %v2166_v32  ;;  %3189 = vst [vmem:[#allocation23_spill] sm:$0xff] %v2267_v1  ;;  %v2286_v10 = vld [vmem:[#allocation9 + $0xd0] sm:$0xff]  ;;  %v2290_v12 = vld [vmem:[#allocation9 + $0x68] sm:$0xff]  ;;  %v2292_v13 = vld [vmem:[#allocation9 + $0x98] sm:$0xff] }
  0x30   :  { %400 = vmatpush.msrb.mxu0 %v2169_v33  ;;  %457 = vmatpush.msra.mxu3 %v2171_v34  ;;  %3190 = vst [vmem:[#allocation24_spill] sm:$0xff] %v2272_v2  ;;  %v2294_v14 = vld [vmem:[#allocation9] sm:$0xff]  ;;  %v2298_v16 = vld [vmem:[#allocation9 + $0xb0] sm:$0xff]  ;;  %v2305_v17 = vld [vmem:[#allocation9 + $0x48] sm:$0xff] }
  0x31   :  { %1638 = vmatmul.msk.f32.gmra.mxu0 %vm140_vm0, %v108_v35  ;;  %418 = vmatpush.msra.mxu1 %v2176_v36  ;;  %3191 = vst [vmem:[#allocation25_spill] sm:$0xff] %v2278_v4  ;;  %v2308_v18 = vld [vmem:[#allocation9 + $0x78] sm:$0xff]  ;;  %v2312_v20 = vld [vmem:[#allocation9 + $0x90] sm:$0xff]  ;;  %v2316_v22 = vld [vmem:[#allocation9 + $0x28] sm:$0xff] }
  0x32   :  { %1645 = vmatmul.msk.f32.gmra.mxu1 %vm140_vm0, %v107_v23  ;;  %1653 = vmatmul.msk.f32.gmra.mxu2 %vm140_vm0, %v107_v23  ;;  %3192 = vst [vmem:[#allocation26_spill] sm:$0xff] %v2280_v8 }
  0x33   :  { %1661 = vmatmul.msk.f32.gmra.mxu3 %vm140_vm0, %v107_v23  ;;  %401 = vmatpush.msrb.mxu0 %v2181_v37  ;;  %3193 = vst [vmem:[#allocation27_spill] sm:$0xff] %v2282_v9  ;;  %v2318_v23 = vld [vmem:[#allocation9 + $0x58] sm:$0xff] }
  0x34   :  { %419 = vmatpush.msra.mxu1 %v2186_v38  ;;  %458 = vmatpush.msra.mxu3 %v2188_v39  ;;  %3194 = vst [vmem:[#allocation28_spill] sm:$0xff] %v2286_v10 }
  0x35   :  { %402 = vmatpush.msrb.mxu0 %v2192_v40  ;;  %437 = vmatpush.msra.mxu2 %v2194_v41  ;;  %3195 = vst [vmem:[#allocation29_spill] sm:$0xff] %v2290_v12 }
  0x36   :  { %420 = vmatpush.msra.mxu1 %v2198_v42  ;;  %459 = vmatpush.msra.mxu3 %v2200_v43  ;;  %3196 = vst [vmem:[#allocation30_spill] sm:$0xff] %v2292_v13 }
  0x37   :  { %403 = vmatpush.msrb.mxu0 %v2203_v44  ;;  %438 = vmatpush.msra.mxu2 %v2206_v45  ;;  %3197 = vst [vmem:[#allocation31_spill] sm:$0xff] %v2294_v14 }
  0x38   :  { %421 = vmatpush.msra.mxu1 %v2210_v46  ;;  %460 = vmatpush.msra.mxu3 %v2212_v47  ;;  %3198 = vst [vmem:[#allocation32_spill] sm:$0xff] %v2298_v16 }
  0x39   :  { %1639 = vmatmul.msk.f32.gmra.mxu0 %vm140_vm0, %v109_v48  ;;  %439 = vmatpush.msra.mxu2 %v2216_v49  ;;  %3199 = vst [vmem:[#allocation33_spill] sm:$0xff] %v2305_v17 }
  0x3a   :  { %1646 = vmatmul.msk.f32.gmra.mxu1 %vm140_vm0, %v108_v35  ;;  %1654 = vmatmul.msk.f32.gmra.mxu2 %vm140_vm0, %v108_v35  ;;  %3200 = vst [vmem:[#allocation34_spill] sm:$0xff] %v2308_v18 }
  0x3b   :  { %1662 = vmatmul.msk.f32.gmra.mxu3 %vm140_vm0, %v108_v35  ;;  %404 = vmatpush.msrb.mxu0 %v2220_v50  ;;  %3201 = vst [vmem:[#allocation35_spill] sm:$0xff] %v2312_v20  ;;  %v2322_v35 = vld [vmem:[#allocation9 + $0x70] sm:$0xff] }
  0x3c   :  { %422 = vmatpush.msra.mxu1 %v2225_v51  ;;  %461 = vmatpush.msra.mxu3 %v2227_v52  ;;  %3202 = vst [vmem:[#allocation36_spill] sm:$0xff] %v2316_v22 }
  0x3d   :  { %405 = vmatpush.msrb.mxu0 %v2232_v53  ;;  %440 = vmatpush.msra.mxu2 %v2234_v54  ;;  %3203 = vst [vmem:[#allocation37_spill] sm:$0xff] %v2318_v23 }
  0x3e   :  { %423 = vmatpush.msra.mxu1 %v2238_v55  ;;  %462 = vmatpush.msra.mxu3 %v2240_v56  ;;  %3204 = vst [vmem:[#allocation38_spill] sm:$0xff] %v2322_v35 }
  0x3f   :  { %406 = vmatpush.msrb.mxu0 %v2242_v57  ;;  %441 = vmatpush.msra.mxu2 %v2246_v58 }
  0x40   :  { %424 = vmatpush.msra.mxu1 %v2250_v59  ;;  %463 = vmatpush.msra.mxu3 %v2252_v60 }
  0x41   :  { %1640 = vmatmul.msk.f32.gmra.mxu0 %vm140_vm0, %v110_v61  ;;  %442 = vmatpush.msra.mxu2 %v2256_v62 }
  0x42   :  { %1647 = vmatmul.msk.f32.gmra.mxu1 %vm140_vm0, %v109_v48  ;;  %1655 = vmatmul.msk.f32.gmra.mxu2 %vm140_vm0, %v109_v48 }
  0x43   :  { %1663 = vmatmul.msk.f32.gmra.mxu3 %vm140_vm0, %v109_v48  ;;  %407 = vmatpush.msrb.mxu0 %v2260_v63  ;;  %v2325_v48 = vld [vmem:[#allocation9 + $0x8] sm:$0xff] }
  0x44   :  { %425 = vmatpush.msra.mxu1 %v2265_v0  ;;  %464 = vmatpush.msra.mxu3 %v2267_v1  ;;  %3205 = vst [vmem:[#allocation39_spill] sm:$0xff] %v2325_v48 }
  0x45   :  { %408 = vmatpush.msrb.mxu0 %v2272_v2  ;;  %443 = vmatpush.msra.mxu2 %v2274_v3 }
  0x46   :  { %426 = vmatpush.msra.mxu1 %v2278_v4  ;;  %465 = vmatpush.msra.mxu3 %v2280_v8 }
  0x47   :  { %409 = vmatpush.msrb.mxu0 %v2282_v9  ;;  %444 = vmatpush.msra.mxu2 %v2286_v10  ;;  %v2341_v9 = vld [vmem:[#allocation9 + $0x18] sm:$0xff] }
  0x48   :  { %427 = vmatpush.msra.mxu1 %v2290_v12  ;;  %466 = vmatpush.msra.mxu3 %v2292_v13  ;;  %3209 = vst [vmem:[#allocation43_spill] sm:$0xff] %v2341_v9 }
  0x49   :  { %410 = vmatpush.msrb.mxu0 %v2294_v14  ;;  %445 = vmatpush.msra.mxu2 %v2298_v16  ;;  %v2327_v14 = vld [vmem:[#allocation9 + $0x38] sm:$0xff] }
  0x4a   :  { %1648 = vmatmul.msk.f32.gmra.mxu1 %vm140_vm0, %v110_v61  ;;  %1656 = vmatmul.msk.f32.gmra.mxu2 %vm140_vm0, %v110_v61  ;;  %3206 = vst [vmem:[#allocation40_spill] sm:$0xff] %v2327_v14 }
  0x4b   :  { %1664 = vmatmul.msk.f32.gmra.mxu3 %vm140_vm0, %v110_v61  ;;  %411 = vmatmul.f32.vlgmr.msrb.gmra.mxu0 %v3086_v21  ;;  %v2332_v61 = vld [vmem:[#allocation9 + $0x50] sm:$0xff] }
  0x4c   :  { %428 = vmatpush.msra.mxu1 %v2305_v17  ;;  %467 = vmatpush.msra.mxu3 %v2308_v18  ;;  %3207 = vst [vmem:[#allocation41_spill] sm:$0xff] %v2332_v61  ;;  %v2337_v21 = vld [vmem:[#allocation9 + $0x30] sm:$0xff] }
  0x4d   :  { %446 = vmatpush.msra.mxu2 %v2312_v20  ;;  %542 = vmatpush.msra.mxu0 %v2130_v11  ;;  %3208 = vst [vmem:[#allocation42_spill] sm:$0xff] %v2337_v21  ;;  %v2348_v11 = vld [vmem:[#allocation9 + $0x10] sm:$0xff] }
  0x4e   :  { %429 = vmatpush.msra.mxu1 %v2316_v22  ;;  %468 = vmatpush.msra.mxu3 %v2318_v23  ;;  %3210 = vst [vmem:[#allocation44_spill] sm:$0xff] %v2348_v11 }
  0x4f   :  { %447 = vmatpush.msra.mxu2 %v2322_v35  ;;  %543 = vmatpush.msra.mxu0 %v2136_v15 }
  0x50   :  { %430 = vmatpush.msra.mxu1 %v2325_v48  ;;  %469 = vmatpush.msra.mxu3 %v2327_v14 }
  0x51   :  { %448 = vmatpush.msra.mxu2 %v2332_v61  ;;  %544 = vmatpush.msra.mxu0 %v2139_v19 }
  0x52   :  { %562 = vmatpush.msrb.mxu1 %v2143_v24  ;;  %1657 = vmatmul.msk.f32.gmra.mxu2 %vm140_vm0, %v2121_v5 }
  0x53   :  { %1649 = vmatmul.msk.f32.gmra.mxu1 %vm140_vm0, %v2121_v5  ;;  %1665 = vmatmul.msk.f32.gmra.mxu3 %vm140_vm0, %v2121_v5  ;;  %v3211_v5 = vmov 0.0  }
  0x54   :  { %449 = vmatpush.msra.mxu2 %v2337_v21  ;;  %470 = vmatpush.msra.mxu3 %v2341_v9 }
  0x55   :  { %563 = vmatpush.msrb.mxu1 %v2152_v27  ;;  %545 = vmatpush.msra.mxu0 %v2148_v26 }
  0x56   :  { %450 = vmatpush.msra.mxu2 %v2348_v11  ;;  %602 = vmatpush.msrb.mxu3 %v2146_v25 }
  0x57   :  { %564 = vmatpush.msrb.mxu1 %v2164_v31  ;;  %546 = vmatpush.msra.mxu0 %v2158_v29 }
  0x58   :  { %582 = vmatpush.msrb.mxu2 %v2154_v28  ;;  %603 = vmatpush.msrb.mxu3 %v2160_v30 }
  0x59   :  { %565 = vmatpush.msrb.mxu1 %v2176_v36  ;;  %547 = vmatpush.msra.mxu0 %v2169_v33 }
  0x5a   :  { %583 = vmatpush.msrb.mxu2 %v2166_v32  ;;  %604 = vmatpush.msrb.mxu3 %v2171_v34 }
  0x5b   :  { %1650 = vmatmul.msk.f32.gmra.mxu1 %vm140_vm0, %v2123_v6  ;;  %1658 = vmatmul.msk.f32.gmra.mxu2 %vm140_vm0, %v2123_v6 }
  0x5c   :  { %1666 = vmatmul.msk.f32.gmra.mxu3 %vm140_vm0, %v2123_v6  ;;  %584 = vmatpush.msrb.mxu2 %v2194_v41  ;;  %v3212_v6 = vld [vmem:[#allocation27_spill] sm:$0xff] }
  0x5d   :  { %605 = vmatpush.msrb.mxu3 %v2188_v39  ;;  %566 = vmatpush.msrb.mxu1 %v2186_v38 }
  0x5e   :  { %585 = vmatpush.msrb.mxu2 %v2206_v45  ;;  %548 = vmatpush.msra.mxu0 %v2181_v37 }
  0x5f   :  { %606 = vmatpush.msrb.mxu3 %v2200_v43  ;;  %567 = vmatpush.msrb.mxu1 %v2198_v42 }
  0x60   :  { %586 = vmatpush.msrb.mxu2 %v2216_v49  ;;  %549 = vmatpush.msra.mxu0 %v2192_v40 }
  0x61   :  { %607 = vmatpush.msrb.mxu3 %v2212_v47  ;;  %568 = vmatpush.msrb.mxu1 %v2210_v46 }
  0x62   :  { %587 = vmatpush.msrb.mxu2 %v2234_v54  ;;  %550 = vmatpush.msra.mxu0 %v2203_v44 }
  0x63   :  { %1651 = vmatmul.msk.f32.gmra.mxu1 %vm140_vm0, %v2125_v7  ;;  %1659 = vmatmul.msk.f32.gmra.mxu2 %vm140_vm0, %v2125_v7 }
  0x64   :  { %1667 = vmatmul.msk.f32.gmra.mxu3 %vm140_vm0, %v2125_v7  ;;  %588 = vmatpush.msrb.mxu2 %v2246_v58  ;;  %v3213_v7 = vld [vmem:[#allocation31_spill] sm:$0xff] }
  0x65   :  { %608 = vmatpush.msrb.mxu3 %v2227_v52  ;;  %569 = vmatpush.msrb.mxu1 %v2225_v51 }
  0x66   :  { %589 = vmatpush.msrb.mxu2 %v2256_v62  ;;  %551 = vmatpush.msra.mxu0 %v2220_v50 }
  0x67   :  { %609 = vmatpush.msrb.mxu3 %v2240_v56  ;;  %570 = vmatpush.msrb.mxu1 %v2238_v55 }
  0x68   :  { %590 = vmatpush.msrb.mxu2 %v2274_v3  ;;  %552 = vmatpush.msra.mxu0 %v2232_v53 }
  0x69   :  { %610 = vmatpush.msrb.mxu3 %v2252_v60  ;;  %571 = vmatpush.msrb.mxu1 %v2250_v59 }
  0x6a   :  { %591 = vmatpush.msrb.mxu2 %v2286_v10  ;;  %553 = vmatpush.msra.mxu0 %v2242_v57 }
  0x6b   :  { %431 = vmatmul.f32.vlgmr.msra.gmra.mxu1 %v3211_v5  ;;  %451 = vmatmul.f32.vlgmr.msra.gmra.mxu2 %v3211_v5 }
  0x6c   :  { %471 = vmatmul.f32.vlgmr.msra.gmra.mxu3 %v3211_v5  ;;  %572 = vmatpush.msrb.mxu1 %v2265_v0  ;;  %v3214_v5 = vld [vmem:[#allocation18_spill] sm:$0xff] }
  0x6d   :  { %611 = vmatpush.msrb.mxu3 %v2267_v1  ;;  %592 = vmatpush.msrb.mxu2 %v2298_v16 }
  0x6e   :  { %573 = vmatpush.msrb.mxu1 %v2278_v4  ;;  %554 = vmatpush.msra.mxu0 %v2260_v63 }
  0x6f   :  { %612 = vmatpush.msrb.mxu3 %v2280_v8  ;;  %593 = vmatpush.msrb.mxu2 %v2312_v20 }
  0x70   :  { %574 = vmatpush.msrb.mxu1 %v2290_v12  ;;  %555 = vmatpush.msra.mxu0 %v2272_v2 }
  0x71   :  { %613 = vmatpush.msrb.mxu3 %v2292_v13  ;;  %594 = vmatpush.msrb.mxu2 %v2322_v35 }
  0x72   :  { %575 = vmatpush.msrb.mxu1 %v2305_v17  ;;  %556 = vmatpush.msra.mxu0 %v3212_v6 }
  0x73   :  { %614 = vmatpush.msrb.mxu3 %v2308_v18  ;;  %595 = vmatpush.msrb.mxu2 %v2332_v61 }
  0x74   :  { %576 = vmatpush.msrb.mxu1 %v2316_v22  ;;  %557 = vmatpush.msra.mxu0 %v3213_v7 }
  0x75   :  { %615 = vmatpush.msrb.mxu3 %v2318_v23  ;;  %596 = vmatpush.msrb.mxu2 %v2337_v21 }
  0x76   :  { %577 = vmatpush.msrb.mxu1 %v2325_v48  ;;  %689 = vmatpush.msrb.mxu0 %v3214_v5 }
  0x77   :  { %616 = vmatpush.msrb.mxu3 %v2327_v14  ;;  %597 = vmatpush.msrb.mxu2 %v2348_v11 }
  0x78   :  { %709 = vmatpush.msra.mxu1 %v2143_v24  ;;  %690 = vmatpush.msrb.mxu0 %v2136_v15 }
  0x79   :  { %617 = vmatpush.msrb.mxu3 %v2341_v9  ;;  %729 = vmatpush.msra.mxu2 %v2154_v28 }
  0x7a   :  { %710 = vmatpush.msra.mxu1 %v2152_v27  ;;  %691 = vmatpush.msrb.mxu0 %v2139_v19 }
  0x7b   :  { %749 = vmatpush.msra.mxu3 %v2146_v25  ;;  %730 = vmatpush.msra.mxu2 %v2166_v32 }
  0x7c   :  { %711 = vmatpush.msra.mxu1 %v2164_v31  ;;  %692 = vmatpush.msrb.mxu0 %v2148_v26 }
  0x7d   :  { %750 = vmatpush.msra.mxu3 %v2160_v30  ;;  %731 = vmatpush.msra.mxu2 %v2194_v41 }
  0x7e   :  { %712 = vmatpush.msra.mxu1 %v2176_v36  ;;  %693 = vmatpush.msrb.mxu0 %v2158_v29 }
  0x7f   :  { %751 = vmatpush.msra.mxu3 %v2171_v34  ;;  %732 = vmatpush.msra.mxu2 %v2206_v45 }
  0x80   :  { %713 = vmatpush.msra.mxu1 %v2186_v38  ;;  %694 = vmatpush.msrb.mxu0 %v2169_v33 }
  0x81   :  { %752 = vmatpush.msra.mxu3 %v2188_v39  ;;  %733 = vmatpush.msra.mxu2 %v2216_v49 }
  0x82   :  { %714 = vmatpush.msra.mxu1 %v2198_v42  ;;  %695 = vmatpush.msrb.mxu0 %v2181_v37 }
  0x83   :  { %753 = vmatpush.msra.mxu3 %v2200_v43  ;;  %734 = vmatpush.msra.mxu2 %v2234_v54 }
  0x84   :  { %715 = vmatpush.msra.mxu1 %v2210_v46  ;;  %696 = vmatpush.msrb.mxu0 %v2192_v40 }
  0x85   :  { %754 = vmatpush.msra.mxu3 %v2212_v47  ;;  %735 = vmatpush.msra.mxu2 %v2246_v58 }
  0x86   :  { %716 = vmatpush.msra.mxu1 %v2225_v51  ;;  %697 = vmatpush.msrb.mxu0 %v2203_v44 }
  0x87   :  { %755 = vmatpush.msra.mxu3 %v2227_v52  ;;  %736 = vmatpush.msra.mxu2 %v2256_v62 }
  0x88   :  { %717 = vmatpush.msra.mxu1 %v2238_v55  ;;  %698 = vmatpush.msrb.mxu0 %v2220_v50 }
  0x89   :  { %756 = vmatpush.msra.mxu3 %v2240_v56  ;;  %737 = vmatpush.msra.mxu2 %v2274_v3 }
  0x8a   :  { %718 = vmatpush.msra.mxu1 %v2250_v59  ;;  %699 = vmatpush.msrb.mxu0 %v2232_v53 }
  0x8b   :  { %757 = vmatpush.msra.mxu3 %v2252_v60  ;;  %738 = vmatpush.msra.mxu2 %v2286_v10 }
  0x8c   :  { %719 = vmatpush.msra.mxu1 %v2265_v0  ;;  %700 = vmatpush.msrb.mxu0 %v2242_v57 }
  0x8d   :  { %758 = vmatpush.msra.mxu3 %v2267_v1  ;;  %739 = vmatpush.msra.mxu2 %v2298_v16 }
  0x8e   :  { %720 = vmatpush.msra.mxu1 %v2278_v4  ;;  %701 = vmatpush.msrb.mxu0 %v2260_v63 }
  0x8f   :  { %759 = vmatpush.msra.mxu3 %v2280_v8  ;;  %740 = vmatpush.msra.mxu2 %v2312_v20 }
  0x90   :  { %721 = vmatpush.msra.mxu1 %v2290_v12  ;;  %702 = vmatpush.msrb.mxu0 %v2272_v2 }
  0x91   :  { %760 = vmatpush.msra.mxu3 %v2292_v13  ;;  %741 = vmatpush.msra.mxu2 %v2322_v35 }
  0x92   :  { %722 = vmatpush.msra.mxu1 %v2305_v17  ;;  %703 = vmatpush.msrb.mxu0 %v3212_v6 }
  0x93   :  { %761 = vmatpush.msra.mxu3 %v2308_v18  ;;  %742 = vmatpush.msra.mxu2 %v2332_v61  ;;  %v130_v18 = vld [vmem:[#allocation10] sm:$0xf] }
  0x94   :  { %723 = vmatpush.msra.mxu1 %v2316_v22  ;;  %704 = vmatpush.msrb.mxu0 %v3213_v7  ;;  %v132_v61 = vperm.slane %v130_v18, 0  ;;  %v2511_v20 = vperm.slane %v130_v18, 2 }
  0x95   :  { %762 = vmatpush.msra.mxu3 %v2318_v23  ;;  %743 = vmatpush.msra.mxu2 %v2337_v21 }
  0x96   :  { %724 = vmatpush.msra.mxu1 %v2325_v48 }
  0x97   :  { %763 = vmatpush.msra.mxu3 %v2327_v14  ;;  %744 = vmatpush.msra.mxu2 %v2348_v11  ;;  %v133_v11 = vperm.slane %v130_v18, 1 }
  0x99   :  { %764 = vmatpush.msra.mxu3 %v2341_v9 }
  0x9d   :  { %v182_v17 = vpop.f32.mrf.mxu0  ;;  %v197_v23 = vpop.f32.mrf.mxu1 }
  0x9e   :  { %v2495_v2 = vadd.f32 %v197_v23, %v132_v61 }
  0xa0   :  { %3215 = vst [vmem:[#allocation18_spill] sm:$0xff] %v2495_v2 }
  0xa4   :  { %v200_v6 = vpop.f32.mrf.mxu2  ;;  %v203_v22 = vpop.f32.mrf.mxu3 }
  0xa5   :  { %v2497_v35 = vadd.f32 %v200_v6, %v132_v61  ;;  %v2499_v21 = vadd.f32 %v203_v22, %v132_v61  ;;  %v135_v6 = vperm.slane %v130_v18, 3 }
  0xa6   :  { %v185_v14 = vpop.f32.mrf.mxu0 }
  0xa7   :  { %3216 = vst [vmem:[#allocation45_spill] sm:$0xff] %v2497_v35  ;;  %v2501_v7 = vadd.f32 %v185_v14, %v132_v61  ;;  %v223_v48 = vpop.f32.mrf.mxu1 }
  0xa8   :  { %3217 = vst [vmem:[#allocation46_spill] sm:$0xff] %v2499_v21 }
  0xa9   :  { %3218 = vst [vmem:[#allocation47_spill] sm:$0xff] %v2501_v7 }
  0xad   :  { %v2503_v12 = vpop.f32.mrf.mxu2 }
  0xae   :  { %v2505_v63 = vpop.f32.mrf.mxu3  ;;  %v188_v9 = vpop.f32.mrf.mxu0 }
  0xaf   :  { %v2507_v13 = vadd.f32 %v188_v9, %v132_v61  ;;  %v226_v23 = vpop.f32.mrf.mxu1 }
  0xb0   :  { %v2509_v2 = vadd.f32 %v226_v23, %v133_v11 }
  0xb1   :  { %3219 = vst [vmem:[#allocation48_spill] sm:$0xff] %v2507_v13 }
  0xb2   :  { %3220 = vst [vmem:[#allocation49_spill] sm:$0xff] %v2509_v2 }
  0xb5   :  { %v267_v22 = vpop.f32.mrf.mxu2 }
  0xb6   :  { %v2514_v21 = vadd.f32 %v267_v22, %v2511_v20  ;;  %v308_v14 = vpop.f32.mrf.mxu3  ;;  %v191_v35 = vpop.f32.mrf.mxu0 }
  0xb7   :  { %v2516_v7 = vadd.f32 %v308_v14, %v135_v6  ;;  %v2518_v4 = vadd.f32 %v191_v35, %v132_v61  ;;  %v229_v57 = vpop.f32.mrf.mxu1 }
  0xb8   :  { %3221 = vst [vmem:[#allocation50_spill] sm:$0xff] %v2514_v21  ;;  %v2520_v8 = vadd.f32 %v229_v57, %v133_v11 }
  0xb9   :  { %3222 = vst [vmem:[#allocation51_spill] sm:$0xff] %v2516_v7 }
  0xba   :  { %3223 = vst [vmem:[#allocation52_spill] sm:$0xff] %v2518_v4 }
  0xbb   :  { %3224 = vst [vmem:[#allocation53_spill] sm:$0xff] %v2520_v8 }
  0xbd   :  { %v270_v9 = vpop.f32.mrf.mxu2 }
  0xbe   :  { %v2523_v23 = vadd.f32 %v270_v9, %v2511_v20  ;;  %v311_v13 = vpop.f32.mrf.mxu3  ;;  %v194_v2 = vpop.f32.mrf.mxu0 }
  0xbf   :  { %v2525_v18 = vadd.f32 %v311_v13, %v135_v6  ;;  %v2527_v16 = vadd.f32 %v194_v2, %v132_v61  ;;  %v232_v22 = vpop.f32.mrf.mxu1 }
  0xc0   :  { %3225 = vst [vmem:[#allocation54_spill] sm:$0xff] %v2523_v23  ;;  %v2529_v21 = vadd.f32 %v232_v22, %v133_v11 }
  0xc1   :  { %3226 = vst [vmem:[#allocation55_spill] sm:$0xff] %v2525_v18  ;;  %v183_v18 = vadd.f32 %v182_v17, %v132_v61 }
  0xc2   :  { %3227 = vst [vmem:[#allocation56_spill] sm:$0xff] %v2527_v16 }
  0xc3   :  { %3228 = vst [vmem:[#allocation57_spill] sm:$0xff] %v2529_v21 }
  0xc5   :  { %v273_v14 = vpop.f32.mrf.mxu2 }
  0xc6   :  { %v2532_v35 = vadd.f32 %v273_v14, %v2511_v20  ;;  %v314_v4 = vpop.f32.mrf.mxu3 }
  0xc7   :  { %v2534_v57 = vadd.f32 %v314_v4, %v135_v6  ;;  %v235_v8 = vpop.f32.mrf.mxu1 }
  0xc8   :  { %3229 = vst [vmem:[#allocation58_spill] sm:$0xff] %v2532_v35  ;;  %v2536_v7 = vadd.f32 %v235_v8, %v133_v11  ;;  %v412_v21 = vpop.f32.mrf.mxu0 }
  0xc9   :  { %3230 = vst [vmem:[#allocation59_spill] sm:$0xff] %v2534_v57  ;;  %v475_v14 = vadd.f32 %v412_v21, %v183_v18 }
  0xca   :  { %3231 = vst [vmem:[#allocation60_spill] sm:$0xff] %v2536_v7 }
  0xcb   :  { %v1668_v0 = vmul.f32 -1.442695, %v475_v14 }
  0xcd   :  { %v276_v9 = vpop.f32.mrf.mxu2  ;;  %1716 = vpow2.f32 %v1668_v0 }
  0xce   :  { %v2539_v23 = vadd.f32 %v276_v9, %v2511_v20  ;;  %v317_v13 = vpop.f32.mrf.mxu3 }
  0xcf   :  { %v2541_v2 = vadd.f32 %v317_v13, %v135_v6 }
  0xd0   :  { %3232 = vst [vmem:[#allocation61_spill] sm:$0xff] %v2539_v23  ;;  %v238_v16 = vpop.f32.mrf.mxu1 }
  0xd1   :  { %3233 = vst [vmem:[#allocation62_spill] sm:$0xff] %v2541_v2  ;;  %v2543_v22 = vadd.f32 %v238_v16, %v133_v11 }
  0xd3   :  { %3234 = vst [vmem:[#allocation63_spill] sm:$0xff] %v2543_v22  ;;  %v1717_v61 = vpop.eup %1716 }
  0xd4   :  { %v482_v18 = vadd.f32 1.0, %v1717_v61 }
  0xd5   :  { %v279_v35 = vpop.f32.mrf.mxu2 }
  0xd6   :  { %v2546_v4 = vadd.f32 %v279_v35, %v2511_v20  ;;  %v320_v57 = vpop.f32.mrf.mxu3  ;;  %1718 = vrcp.f32 %v482_v18  ;;  %vm488_vm2 = vweird.f32 %v482_v18 }
  0xd7   :  { %v2548_v8 = vadd.f32 %v320_v57, %v135_v6  ;;  %v224_v57 = vadd.f32 %v223_v48, %v133_v11 }
  0xd8   :  { %3235 = vst [vmem:[#allocation64_spill] sm:$0xff] %v2546_v4  ;;  %v241_v7 = vpop.f32.mrf.mxu1 }
  0xd9   :  { %3236 = vst [vmem:[#allocation65_spill] sm:$0xff] %v2548_v8  ;;  %v2550_v9 = vadd.f32 %v241_v7, %v133_v11 }
  0xdb   :  { %3237 = vst [vmem:[#allocation66_spill] sm:$0xff] %v2550_v9 }
  0xde   :  { %v282_v13 = vpop.f32.mrf.mxu2 }
  0xdf   :  { %v2553_v23 = vadd.f32 %v282_v13, %v2511_v20  ;;  %v323_v16 = vpop.f32.mrf.mxu3 }
  0xe0   :  { %v2555_v22 = vadd.f32 %v323_v16, %v135_v6  ;;  %v244_v17 = vpop.f32.mrf.mxu1  ;;  %v306_v16 = vadd.f32 %v2505_v63, %v135_v6 }
  0xe1   :  { %3238 = vst [vmem:[#allocation67_spill] sm:$0xff] %v2553_v23  ;;  %v2557_v21 = vadd.f32 %v244_v17, %v133_v11  ;;  %v1719_v17 = vpop.eup %1718 }
  0xe2   :  { %3239 = vst [vmem:[#allocation68_spill] sm:$0xff] %v2555_v22  ;;  %v484_v8 = vmul.f32 %v1719_v17, %v482_v18  ;;  %vm489_vm1 = vweird.f32 %v1719_v17 }
  0xe3   :  { %3240 = vst [vmem:[#allocation69_spill] sm:$0xff] %v2557_v21  ;;  %vm490_vm4 = vmor %vm488_vm2, %vm489_vm1 }
  0xe4   :  { %v485_v48 = vsub.f32 1.0, %v484_v8  ;;  %v492_v8 = vand.u32 2147483647, %v482_v18 }
  0xe6   :  { %v285_v35 = vpop.f32.mrf.mxu2  ;;  %vm493_vm7 = vcmp.eq.f32.partialorder %v492_v8, 8.507059e+37 }
  0xe7   :  { %v2560_v4 = vadd.f32 %v285_v35, %v2511_v20  ;;  %v326_v7 = vpop.f32.mrf.mxu3 }
  0xe8   :  { %v2562_v14 = vadd.f32 %v326_v7, %v135_v6  ;;  %v432_v0 = vpop.f32.mrf.mxu1  ;;  %v265_v7 = vadd.f32 %v2503_v12, %v2511_v20 }
  0xe9   :  { %3241 = vst [vmem:[#allocation70_spill] sm:$0xff] %v2560_v4  ;;  %v476_v9 = vadd.f32 %v432_v0, %v224_v57 }
  0xea   :  { %3242 = vst [vmem:[#allocation71_spill] sm:$0xff] %v2562_v14 }
  0xeb   :  { %v1669_v13 = vmul.f32 -1.442695, %v476_v9  ;;  %v486_v9 = vmul.f32 %v1719_v17, %v485_v48 }
  0xed   :  { %1720 = vpow2.f32 %v1669_v13 }
  0xee   :  { %v452_v35 = vpop.f32.mrf.mxu2 }
  0xef   :  { %v472_v23 = vpop.f32.mrf.mxu3  ;;  %v477_v0 = vadd.f32 %v452_v35, %v265_v7 }
  0xf0   :  { %v478_v21 = vadd.f32 %v472_v23, %v306_v16  ;;  %v487_v23 = vadd.f32 %v1719_v17, %v486_v9 }
  0xf2   :  { %v1670_v22 = vmul.f32 -1.442695, %v478_v21  ;;  %v491_v20 = vsel %vm490_vm4, %v1719_v17, %v487_v23 }
  0xf3   :  { %v1721_v61 = vpop.eup %1720 }
  0xf4   :  { %v501_v11 = vadd.f32 1.0, %v1721_v61  ;;  %1722 = vpow2.f32 %v1670_v22  ;;  %v494_v22 = vand.u32 2147483648, %v482_v18 }
  0xf6   :  { %1724 = vrcp.f32 %v501_v11  ;;  %v513_v21 = vand.u32 2147483648, %v501_v11  ;;  %v511_v61 = vand.u32 2147483647, %v501_v11  ;;  %vm507_vm5 = vweird.f32 %v501_v11 }
  0xf8   :  { %v514_v7 = vor.u32 1.1754944e-38, %v513_v21  ;;  %vm512_vm8 = vcmp.eq.f32.partialorder %v511_v61, 8.507059e+37 }
  0xfa   :  { %v1723_v57 = vpop.eup %1722 }
  0xfb   :  { %v521_v13 = vadd.f32 1.0, %v1723_v57  ;;  %v495_v57 = vor.u32 1.1754944e-38, %v494_v22 }
  0xfc   :  { %v1725_v4 = vpop.eup %1724 }
  0xfd   :  { %v503_v63 = vmul.f32 %v1725_v4, %v501_v11  ;;  %1726 = vrcp.f32 %v521_v13  ;;  %vm508_vm3 = vweird.f32 %v1725_v4  ;;  %v533_v17 = vand.u32 2147483648, %v521_v13 }
  0xfe   :  { %1728 = vtanh.f32 %v477_v0  ;;  %vm509_vm6 = vmor %vm507_vm5, %vm508_vm3  ;;  %vm527_vm10 = vweird.f32 %v521_v13  ;;  %v531_v11 = vand.u32 2147483647, %v521_v13 }
  0xff   :  { %v504_v6 = vsub.f32 1.0, %v503_v63  ;;  %v496_v63 = vsel %vm493_vm7, %v495_v57, %v491_v20  ;;  %v534_v21 = vor.u32 1.1754944e-38, %v533_v17  ;;  %v3272_v20 = vld [vmem:[#allocation50_spill] sm:$0xff] }
 0x100   :  { %vm532_vm12 = vcmp.eq.f32.partialorder %v531_v11, 8.507059e+37 }
 0x101   :  { %v505_v16 = vmul.f32 %v1725_v4, %v504_v6 }
 0x103   :  { %v1727_v12 = vpop.eup %1726  ;;  %v506_v48 = vadd.f32 %v1725_v4, %v505_v16 }
 0x104   :  { %v1729_v35 = vpop.eup %1728  ;;  %v523_v0 = vmul.f32 %v1727_v12, %v521_v13  ;;  %vm528_vm9 = vweird.f32 %v1727_v12 }
 0x105   :  { %v510_v9 = vsel %vm509_vm6, %v1725_v4, %v506_v48  ;;  %v538_v18 = vmul.f32 %v1729_v35, %v496_v63  ;;  %vm529_vm11 = vmor %vm527_vm10, %vm528_vm9 }
 0x106   :  { %v515_v14 = vsel %vm512_vm8, %v514_v7, %v510_v9  ;;  %v524_v2 = vsub.f32 1.0, %v523_v0 }
 0x107   :  { %v537_v6 = vmul.f32 0.0, %v515_v14 }
 0x108   :  { %v525_v53 = vmul.f32 %v1727_v12, %v524_v2 }
 0x109   :  { %v2567_v1 = vadd.f32 %v538_v18, %v537_v6 }
 0x10a   :  { %v526_v10 = vadd.f32 %v1727_v12, %v525_v53 }
 0x10b   :  { %1730 = vtanh.f32 %v2567_v1 }
 0x10c   :  { %v530_v23 = vsel %vm529_vm11, %v1727_v12, %v526_v10 }
 0x10d   :  { %v535_v22 = vsel %vm532_vm12, %v534_v21, %v530_v23 }
 0x111   :  { %v1731_v4 = vpop.eup %1730 }
 0x112   :  { %v541_v16 = vmul.f32 %v1731_v4, %v535_v22 }
 0x114   :  { %558 = vmatmul.f32.vlgmr.msra.gmra.mxu0 %v541_v16  ;;  %578 = vmatmul.f32.vlgmr.msrb.gmra.mxu1 %v541_v16 }
 0x115   :  { %598 = vmatmul.f32.vlgmr.msrb.gmra.mxu2 %v541_v16  ;;  %618 = vmatmul.f32.vlgmr.msrb.gmra.mxu3 %v541_v16 }
 0x116   :  { %836 = vmatpush.msra.mxu0 %v3214_v5  ;;  %856 = vmatpush.msrb.mxu1 %v2143_v24  ;;  %v3245_v24 = vld [vmem:[#allocation19_spill] sm:$0xff] }
 0x117   :  { %876 = vmatpush.msrb.mxu2 %v2154_v28  ;;  %896 = vmatpush.msrb.mxu3 %v2146_v25  ;;  %v3246_v25 = vld [vmem:[#allocation22_spill] sm:$0xff]  ;;  %v3249_v28 = vld [vmem:[#allocation20_spill] sm:$0xff] }
 0x118   :  { %837 = vmatpush.msra.mxu0 %v2136_v15  ;;  %857 = vmatpush.msrb.mxu1 %v2152_v27  ;;  %v3243_v15 = vld [vmem:[#allocation28_spill] sm:$0xff]  ;;  %v3248_v27 = vld [vmem:[#allocation26_spill] sm:$0xff] }
 0x119   :  { %877 = vmatpush.msrb.mxu2 %v2166_v32  ;;  %897 = vmatpush.msrb.mxu3 %v2160_v30  ;;  %v3251_v30 = vld [vmem:[#allocation35_spill] sm:$0xff]  ;;  %v3253_v32 = vld [vmem:[#allocation21_spill] sm:$0xff] }
 0x11a   :  { %838 = vmatpush.msra.mxu0 %v2139_v19  ;;  %858 = vmatpush.msrb.mxu1 %v2164_v31  ;;  %v3244_v19 = vld [vmem:[#allocation23_spill] sm:$0xff]  ;;  %v3252_v31 = vld [vmem:[#allocation30_spill] sm:$0xff] }
 0x11b   :  { %878 = vmatpush.msrb.mxu2 %v2194_v41  ;;  %898 = vmatpush.msrb.mxu3 %v2171_v34  ;;  %v3255_v34 = vld [vmem:[#allocation38_spill] sm:$0xff]  ;;  %v3261_v41 = vld [vmem:[#allocation27_spill] sm:$0xff] }
 0x11c   :  { %839 = vmatpush.msra.mxu0 %v2148_v26  ;;  %859 = vmatpush.msrb.mxu1 %v2176_v36  ;;  %v3247_v26 = vld [vmem:[#allocation32_spill] sm:$0xff]  ;;  %v3256_v36 = vld [vmem:[#allocation34_spill] sm:$0xff] }
 0x11d   :  { %879 = vmatpush.msrb.mxu2 %v2206_v45  ;;  %899 = vmatpush.msrb.mxu3 %v2188_v39  ;;  %v3259_v39 = vld [vmem:[#allocation41_spill] sm:$0xff]  ;;  %v3265_v45 = vld [vmem:[#allocation31_spill] sm:$0xff] }
 0x11e   :  { %840 = vmatpush.msra.mxu0 %v2158_v29  ;;  %860 = vmatpush.msrb.mxu1 %v2186_v38  ;;  %v3250_v29 = vld [vmem:[#allocation25_spill] sm:$0xff] }
 0x11f   :  { %880 = vmatpush.msrb.mxu2 %v2216_v49  ;;  %900 = vmatpush.msrb.mxu3 %v2200_v43  ;;  %v3258_v38 = vld [vmem:[#allocation33_spill] sm:$0xff]  ;;  %v3263_v43 = vld [vmem:[#allocation42_spill] sm:$0xff]  ;;  %v3268_v49 = vld [vmem:[#allocation43_spill] sm:$0xff] }
 0x120   :  { %841 = vmatpush.msra.mxu0 %v2169_v33  ;;  %861 = vmatpush.msrb.mxu1 %v2198_v42  ;;  %v3254_v33 = vld [vmem:[#allocation29_spill] sm:$0xff]  ;;  %v3262_v42 = vld [vmem:[#allocation36_spill] sm:$0xff] }
 0x121   :  { %881 = vmatpush.msrb.mxu2 %v2234_v54  ;;  %901 = vmatpush.msrb.mxu3 %v2212_v47  ;;  %v3267_v47 = vld [vmem:[#allocation44_spill] sm:$0xff]  ;;  %v3270_v54 = vld [vmem:[#allocation49_spill] sm:$0xff] }
 0x122   :  { %842 = vmatpush.msra.mxu0 %v2181_v37  ;;  %862 = vmatpush.msrb.mxu1 %v2210_v46  ;;  %v3257_v37 = vld [vmem:[#allocation24_spill] sm:$0xff]  ;;  %v3266_v46 = vld [vmem:[#allocation39_spill] sm:$0xff] }
 0x123   :  { %882 = vmatpush.msrb.mxu2 %v2246_v58  ;;  %902 = vmatpush.msrb.mxu3 %v2227_v52  ;;  %v3269_v52 = vld [vmem:[#allocation47_spill] sm:$0xff] }
 0x124   :  { %843 = vmatpush.msra.mxu0 %v2192_v40  ;;  %863 = vmatpush.msrb.mxu1 %v2225_v51  ;;  %v3260_v40 = vld [vmem:[#allocation37_spill] sm:$0xff] }
 0x125   :  { %883 = vmatpush.msrb.mxu2 %v2256_v62  ;;  %903 = vmatpush.msrb.mxu3 %v2240_v56 }
 0x126   :  { %844 = vmatpush.msra.mxu0 %v2203_v44  ;;  %864 = vmatpush.msrb.mxu1 %v2238_v55  ;;  %v3264_v44 = vld [vmem:[#allocation40_spill] sm:$0xff] }
 0x127   :  { %884 = vmatpush.msrb.mxu2 %v2274_v3  ;;  %904 = vmatpush.msrb.mxu3 %v2252_v60  ;;  %v3271_v60 = vld [vmem:[#allocation51_spill] sm:$0xff] }
 0x128   :  { %845 = vmatpush.msra.mxu0 %v2220_v50  ;;  %865 = vmatpush.msrb.mxu1 %v2250_v59 }
 0x129   :  { %885 = vmatpush.msrb.mxu2 %v3243_v15  ;;  %905 = vmatpush.msrb.mxu3 %v3244_v19 }
 0x12a   :  { %846 = vmatpush.msra.mxu0 %v3245_v24  ;;  %866 = vmatpush.msrb.mxu1 %v3246_v25 }
 0x12b   :  { %886 = vmatpush.msrb.mxu2 %v3247_v26  ;;  %906 = vmatpush.msrb.mxu3 %v3248_v27 }
 0x12c   :  { %847 = vmatpush.msra.mxu0 %v3249_v28  ;;  %867 = vmatpush.msrb.mxu1 %v3250_v29 }
 0x12d   :  { %887 = vmatpush.msrb.mxu2 %v3251_v30  ;;  %907 = vmatpush.msrb.mxu3 %v3252_v31 }
 0x12e   :  { %848 = vmatpush.msra.mxu0 %v3253_v32  ;;  %868 = vmatpush.msrb.mxu1 %v3254_v33 }
 0x12f   :  { %888 = vmatpush.msrb.mxu2 %v3255_v34  ;;  %908 = vmatpush.msrb.mxu3 %v3256_v36 }
 0x130   :  { %849 = vmatpush.msra.mxu0 %v3257_v37  ;;  %869 = vmatpush.msrb.mxu1 %v3258_v38 }
 0x131   :  { %889 = vmatpush.msrb.mxu2 %v3259_v39  ;;  %909 = vmatpush.msrb.mxu3 %v3260_v40 }
 0x132   :  { %850 = vmatpush.msra.mxu0 %v3261_v41  ;;  %870 = vmatpush.msrb.mxu1 %v3262_v42 }
 0x133   :  { %890 = vmatpush.msrb.mxu2 %v3263_v43  ;;  %910 = vmatpush.msrb.mxu3 %v3264_v44 }
 0x134   :  { %851 = vmatpush.msra.mxu0 %v3265_v45  ;;  %871 = vmatpush.msrb.mxu1 %v3266_v46 }
 0x135   :  { %891 = vmatpush.msrb.mxu2 %v3267_v47  ;;  %911 = vmatpush.msrb.mxu3 %v3268_v49 }
 0x191   :  { %v559_v50 = vpop.f32.mrf.mxu0  ;;  %v579_v51 = vpop.f32.mrf.mxu1 }
 0x192   :  { %v622_v53 = vadd.f32 %v559_v50, %v3269_v52  ;;  %v623_v55 = vadd.f32 %v579_v51, %v3270_v54 }
 0x194   :  { %v1671_v56 = vmul.f32 -1.442695, %v622_v53  ;;  %v1672_v58 = vmul.f32 -1.442695, %v623_v55 }
 0x196   :  { %1732 = vpow2.f32 %v1671_v56 }
 0x197   :  { %1734 = vpow2.f32 %v1672_v58 }
 0x198   :  { %v619_v59 = vpop.f32.mrf.mxu3  ;;  %v599_v13 = vpop.f32.mrf.mxu2 }
 0x199   :  { %v625_v62 = vadd.f32 %v619_v59, %v3271_v60  ;;  %v624_v48 = vadd.f32 %v599_v13, %v3272_v20  ;;  %v2645_v59 = vld [vmem:[#allocation9 + $0x1e8] sm:$0xff]  ;;  %v2648_v60 = vld [vmem:[#allocation9 + $0x1f0] sm:$0xff] }
 0x19a   :  { %v2669_v13 = vld [vmem:[#allocation9 + $0x1a8] sm:$0xff] }
 0x19b   :  { %v1673_v3 = vmul.f32 -1.442695, %v625_v62  ;;  %v2651_v62 = vld [vmem:[#allocation9 + $0x1f8] sm:$0xff]  ;;  %v2681_v20 = vld [vmem:[#allocation9 + $0x188] sm:$0xff] }
 0x19c   :  { %v1733_v10 = vpop.eup %1732 }
 0x19d   :  { %v1735_v5 = vpop.eup %1734  ;;  %v629_v2 = vadd.f32 1.0, %v1733_v10  ;;  %1736 = vpow2.f32 %v1673_v3  ;;  %v2654_v3 = vld [vmem:[#allocation9 + $0x1c0] sm:$0xff]  ;;  %v2657_v10 = vld [vmem:[#allocation9 + $0x1c8] sm:$0xff] }
 0x19e   :  { %v648_v14 = vadd.f32 1.0, %v1735_v5  ;;  %v2660_v5 = vld [vmem:[#allocation9 + $0x1d0] sm:$0xff] }
 0x19f   :  { %1738 = vrcp.f32 %v629_v2  ;;  %v641_v63 = vand.u32 2147483648, %v629_v2  ;;  %v639_v17 = vand.u32 2147483647, %v629_v2  ;;  %vm635_vm15 = vweird.f32 %v629_v2 }
 0x1a0   :  { %1740 = vrcp.f32 %v648_v14  ;;  %v660_v6 = vand.u32 2147483648, %v648_v14  ;;  %v658_v23 = vand.u32 2147483647, %v648_v14  ;;  %vm654_vm0 = vweird.f32 %v648_v14 }
 0x1a1   :  { %v642_v22 = vor.u32 1.1754944e-38, %v641_v63  ;;  %vm640_vm3 = vcmp.eq.f32.partialorder %v639_v17, 8.507059e+37  ;;  %v2702_v63 = vld [vmem:[#allocation9 + $0x140] sm:$0xff]  ;;  %v2711_v17 = vld [vmem:[#allocation9 + $0x158] sm:$0xff] }
 0x1a2   :  { %v661_v24 = vor.u32 1.1754944e-38, %v660_v6  ;;  %vm659_vm4 = vcmp.eq.f32.partialorder %v658_v23, 8.507059e+37  ;;  %v2705_v6 = vld [vmem:[#allocation9 + $0x148] sm:$0xff] }
 0x1a3   :  { %v1737_v8 = vpop.eup %1736  ;;  %v2717_v23 = vld [vmem:[#allocation9 + $0x128] sm:$0xff] }
 0x1a4   :  { %v668_v61 = vadd.f32 1.0, %v1737_v8  ;;  %v2672_v8 = vld [vmem:[#allocation9 + $0x1b0] sm:$0xff] }
 0x1a5   :  { %v1739_v12 = vpop.eup %1738 }
 0x1a6   :  { %v1741_v35 = vpop.eup %1740  ;;  %v631_v7 = vmul.f32 %v1739_v12, %v629_v2  ;;  %1742 = vrcp.f32 %v668_v61  ;;  %vm636_vm13 = vweird.f32 %v1739_v12  ;;  %v680_v51 = vand.u32 2147483648, %v668_v61  ;;  %v2663_v2 = vld [vmem:[#allocation9 + $0x1d8] sm:$0xff] }
 0x1a7   :  { %v650_v57 = vmul.f32 %v1741_v35, %v648_v14  ;;  %1744 = vtanh.f32 %v624_v48  ;;  %vm655_vm14 = vweird.f32 %v1741_v35  ;;  %vm637_vm1 = vmor %vm635_vm15, %vm636_vm13  ;;  %vm674_vm6 = vweird.f32 %v668_v61  ;;  %v2666_v14 = vld [vmem:[#allocation9 + $0x1a0] sm:$0xff]  ;;  %v2684_v48 = vld [vmem:[#allocation9 + $0x190] sm:$0xff] }
 0x1a8   :  { %v632_v0 = vsub.f32 1.0, %v631_v7  ;;  %vm656_vm2 = vmor %vm654_vm0, %vm655_vm14  ;;  %v678_v52 = vand.u32 2147483647, %v668_v61  ;;  %v681_v54 = vor.u32 1.1754944e-38, %v680_v51  ;;  %v2690_v7 = vld [vmem:[#allocation9 + $0x160] sm:$0xff] }
 0x1a9   :  { %v651_v9 = vsub.f32 1.0, %v650_v57  ;;  %v2693_v57 = vld [vmem:[#allocation9 + $0x168] sm:$0xff]  ;;  %v2770_v51 = vld [vmem:[#allocation9 + $0x80] sm:$0xff] }
 0x1aa   :  { %v633_v18 = vmul.f32 %v1739_v12, %v632_v0  ;;  %vm679_vm8 = vcmp.eq.f32.partialorder %v678_v52, 8.507059e+37  ;;  %v2696_v0 = vld [vmem:[#allocation9 + $0x170] sm:$0xff]  ;;  %3277 = vst [vmem:[#allocation32_spill] sm:$0xff] %v2770_v51  ;;  %v2777_v52 = vld [vmem:[#allocation9 + $0x98] sm:$0xff] }
 0x1ab   :  { %v652_v11 = vmul.f32 %v1741_v35, %v651_v9  ;;  %v2699_v9 = vld [vmem:[#allocation9 + $0x178] sm:$0xff]  ;;  %3279 = vst [vmem:[#allocation20_spill] sm:$0xff] %v2777_v52 }
 0x1ac   :  { %v1743_v21 = vpop.eup %1742  ;;  %v634_v4 = vadd.f32 %v1739_v12, %v633_v18  ;;  %v2708_v18 = vld [vmem:[#allocation9 + $0x150] sm:$0xff] }
 0x1ad   :  { %v653_v16 = vadd.f32 %v1741_v35, %v652_v11  ;;  %v670_v19 = vmul.f32 %v1743_v21, %v668_v61  ;;  %v1745_v27 = vpop.eup %1744  ;;  %vm675_vm5 = vweird.f32 %v1743_v21  ;;  %v2675_v61 = vld [vmem:[#allocation9 + $0x1b8] sm:$0xff]  ;;  %v2714_v11 = vld [vmem:[#allocation9 + $0x120] sm:$0xff] }
 0x1ae   :  { %v638_v25 = vsel %vm637_vm1, %v1739_v12, %v634_v4  ;;  %vm676_vm7 = vmor %vm674_vm6, %vm675_vm5  ;;  %v2678_v12 = vld [vmem:[#allocation9 + $0x180] sm:$0xff]  ;;  %v2723_v4 = vld [vmem:[#allocation9 + $0x138] sm:$0xff] }
 0x1af   :  { %v643_v28 = vsel %vm640_vm3, %v642_v22, %v638_v25  ;;  %v657_v29 = vsel %vm656_vm2, %v1741_v35, %v653_v16  ;;  %v671_v31 = vsub.f32 1.0, %v670_v19  ;;  %v2687_v35 = vld [vmem:[#allocation9 + $0x198] sm:$0xff]  ;;  %v2726_v22 = vld [vmem:[#allocation9 + $0x100] sm:$0xff]  ;;  %v2729_v16 = vld [vmem:[#allocation9 + $0x108] sm:$0xff] }
 0x1b0   :  { %v662_v32 = vsel %vm659_vm4, %v661_v24, %v657_v29  ;;  %v685_v33 = vmul.f32 %v1745_v27, %v643_v28  ;;  %v2732_v19 = vld [vmem:[#allocation9 + $0x110] sm:$0xff]  ;;  %v2735_v24 = vld [vmem:[#allocation9 + $0x118] sm:$0xff]  ;;  %v2738_v25 = vld [vmem:[#allocation9 + $0xe0] sm:$0xff] }
 0x1b1   :  { %v684_v37 = vmul.f32 %v662_v32, %v2567_v1  ;;  %v672_v41 = vmul.f32 %v1743_v21, %v671_v31  ;;  %v2642_v1 = vld [vmem:[#allocation9 + $0x1e0] sm:$0xff]  ;;  %v2741_v27 = vld [vmem:[#allocation9 + $0xe8] sm:$0xff]  ;;  %v2744_v28 = vld [vmem:[#allocation9 + $0xf0] sm:$0xff] }
 0x1b2   :  { %v2747_v29 = vld [vmem:[#allocation9 + $0xf8] sm:$0xff]  ;;  %v2750_v31 = vld [vmem:[#allocation9 + $0xc0] sm:$0xff]  ;;  %v2753_v32 = vld [vmem:[#allocation9 + $0xc8] sm:$0xff] }
 0x1b3   :  { %v2639_v45 = vadd.f32 %v685_v33, %v684_v37  ;;  %v673_v50 = vadd.f32 %v1743_v21, %v672_v41  ;;  %v2757_v33 = vld [vmem:[#allocation9 + $0xd8] sm:$0xff]  ;;  %v2760_v37 = vld [vmem:[#allocation9 + $0xa0] sm:$0xff]  ;;  %v2763_v41 = vld [vmem:[#allocation9 + $0xa8] sm:$0xff] }
 0x1b4   :  { %3273 = vst [vmem:[#allocation28_spill] sm:$0xff] %v2757_v33 }
 0x1b5   :  { %1746 = vtanh.f32 %v2639_v45  ;;  %v677_v53 = vsel %vm676_vm7, %v1743_v21, %v673_v50  ;;  %v2720_v21 = vld [vmem:[#allocation9 + $0x130] sm:$0xff]  ;;  %3274 = vst [vmem:[#allocation23_spill] sm:$0xff] %v2760_v37  ;;  %v2767_v50 = vld [vmem:[#allocation9 + $0xb8] sm:$0xff] }
 0x1b6   :  { %v682_v56 = vsel %vm679_vm8, %v681_v54, %v677_v53  ;;  %3275 = vst [vmem:[#allocation19_spill] sm:$0xff] %v2763_v41  ;;  %v2780_v53 = vld [vmem:[#allocation9 + $0x60] sm:$0xff] }
 0x1b7   :  { %3276 = vst [vmem:[#allocation22_spill] sm:$0xff] %v2767_v50  ;;  %v2788_v54 = vld [vmem:[#allocation9 + $0x40] sm:$0xff] }
 0x1b8   :  { %3280 = vst [vmem:[#allocation25_spill] sm:$0xff] %v2780_v53 }
 0x1b9   :  { %3282 = vst [vmem:[#allocation30_spill] sm:$0xff] %v2788_v54 }
 0x1bb   :  { %v1747_v55 = vpop.eup %1746 }
 0x1bc   :  { %v688_v58 = vmul.f32 %v1747_v55, %v682_v56  ;;  %v3286_v55 = vld [vmem:[#allocation53_spill] sm:$0xff] }
 0x1be   :  { %705 = vmatmul.f32.vlgmr.msrb.gmra.mxu0 %v688_v58  ;;  %725 = vmatmul.f32.vlgmr.msra.gmra.mxu1 %v688_v58 }
 0x1bf   :  { %745 = vmatmul.f32.vlgmr.msra.gmra.mxu2 %v688_v58  ;;  %765 = vmatmul.f32.vlgmr.msra.gmra.mxu3 %v688_v58  ;;  %v3287_v58 = vld [vmem:[#allocation55_spill] sm:$0xff] }
 0x1c0   :  { %983 = vmatpush.msrb.mxu0 %v2642_v1  ;;  %1003 = vmatpush.msra.mxu1 %v2645_v59 }
 0x1c1   :  { %1023 = vmatpush.msra.mxu2 %v2648_v60  ;;  %1043 = vmatpush.msra.mxu3 %v2651_v62 }
 0x1c2   :  { %984 = vmatpush.msrb.mxu0 %v2654_v3  ;;  %1004 = vmatpush.msra.mxu1 %v2657_v10 }
 0x1c3   :  { %1024 = vmatpush.msra.mxu2 %v2660_v5  ;;  %1044 = vmatpush.msra.mxu3 %v2663_v2 }
 0x1c4   :  { %985 = vmatpush.msrb.mxu0 %v2666_v14  ;;  %1005 = vmatpush.msra.mxu1 %v2669_v13 }
 0x1c5   :  { %1025 = vmatpush.msra.mxu2 %v2672_v8  ;;  %1045 = vmatpush.msra.mxu3 %v2675_v61 }
 0x1c6   :  { %986 = vmatpush.msrb.mxu0 %v2678_v12  ;;  %1006 = vmatpush.msra.mxu1 %v2681_v20 }
 0x1c7   :  { %1026 = vmatpush.msra.mxu2 %v2684_v48  ;;  %1046 = vmatpush.msra.mxu3 %v2687_v35 }
 0x1c8   :  { %987 = vmatpush.msrb.mxu0 %v2690_v7  ;;  %1007 = vmatpush.msra.mxu1 %v2693_v57 }
 0x1c9   :  { %1027 = vmatpush.msra.mxu2 %v2696_v0  ;;  %1047 = vmatpush.msra.mxu3 %v2699_v9 }
 0x1ca   :  { %988 = vmatpush.msrb.mxu0 %v2702_v63  ;;  %1008 = vmatpush.msra.mxu1 %v2705_v6 }
 0x1cb   :  { %1028 = vmatpush.msra.mxu2 %v2708_v18  ;;  %1048 = vmatpush.msra.mxu3 %v2711_v17 }
 0x1cc   :  { %989 = vmatpush.msrb.mxu0 %v2714_v11  ;;  %1009 = vmatpush.msra.mxu1 %v2717_v23 }
 0x1cd   :  { %1029 = vmatpush.msra.mxu2 %v2720_v21  ;;  %1049 = vmatpush.msra.mxu3 %v2723_v4 }
 0x1ce   :  { %990 = vmatpush.msrb.mxu0 %v2726_v22  ;;  %1010 = vmatpush.msra.mxu1 %v2729_v16 }
 0x1cf   :  { %1030 = vmatpush.msra.mxu2 %v2732_v19  ;;  %1050 = vmatpush.msra.mxu3 %v2735_v24 }
 0x1d0   :  { %991 = vmatpush.msrb.mxu0 %v2738_v25  ;;  %1011 = vmatpush.msra.mxu1 %v2741_v27 }
 0x1d1   :  { %1031 = vmatpush.msra.mxu2 %v2744_v28  ;;  %1051 = vmatpush.msra.mxu3 %v2747_v29 }
 0x1d2   :  { %992 = vmatpush.msrb.mxu0 %v2750_v31  ;;  %1012 = vmatpush.msra.mxu1 %v2753_v32 }
 0x1d3   :  { %1032 = vmatpush.msra.mxu2 %v3243_v15  ;;  %1052 = vmatpush.msra.mxu3 %v2757_v33  ;;  %v2773_v15 = vld [vmem:[#allocation9 + $0x88] sm:$0xff] }
 0x1d4   :  { %993 = vmatpush.msrb.mxu0 %v2760_v37  ;;  %1013 = vmatpush.msra.mxu1 %v2763_v41  ;;  %3278 = vst [vmem:[#allocation26_spill] sm:$0xff] %v2773_v15 }
 0x1d5   :  { %1033 = vmatpush.msra.mxu2 %v3247_v26  ;;  %1053 = vmatpush.msra.mxu3 %v2767_v50  ;;  %v2783_v26 = vld [vmem:[#allocation9 + $0x68] sm:$0xff] }
 0x1d6   :  { %994 = vmatpush.msrb.mxu0 %v2770_v51  ;;  %1014 = vmatpush.msra.mxu1 %v2773_v15  ;;  %3281 = vst [vmem:[#allocation35_spill] sm:$0xff] %v2783_v26 }
 0x1d7   :  { %1034 = vmatpush.msra.mxu2 %v3251_v30  ;;  %1054 = vmatpush.msra.mxu3 %v2777_v52  ;;  %v2794_v30 = vld [vmem:[#allocation9 + $0x20] sm:$0xff] }
 0x1d8   :  { %995 = vmatpush.msrb.mxu0 %v2780_v53  ;;  %1015 = vmatpush.msra.mxu1 %v2783_v26  ;;  %3283 = vst [vmem:[#allocation21_spill] sm:$0xff] %v2794_v30 }
 0x1d9   :  { %1035 = vmatpush.msra.mxu2 %v3255_v34  ;;  %1055 = vmatpush.msra.mxu3 %v3256_v36  ;;  %v2800_v34 = vld [vmem:[#allocation9] sm:$0xff] }
 0x1da   :  { %996 = vmatpush.msrb.mxu0 %v2788_v54  ;;  %1016 = vmatpush.msra.mxu1 %v3258_v38  ;;  %3284 = vst [vmem:[#allocation29_spill] sm:$0xff] %v2800_v34 }
 0x1db   :  { %1036 = vmatpush.msra.mxu2 %v3259_v39  ;;  %1056 = vmatpush.msra.mxu3 %v3260_v40  ;;  %v3285_v39 = vld [vmem:[#allocation48_spill] sm:$0xff] }
 0x1dc   :  { %997 = vmatpush.msrb.mxu0 %v2794_v30  ;;  %1017 = vmatpush.msra.mxu1 %v3262_v42 }
 0x1dd   :  { %1037 = vmatpush.msra.mxu2 %v3263_v43  ;;  %1057 = vmatpush.msra.mxu3 %v3264_v44 }
 0x1de   :  { %998 = vmatpush.msrb.mxu0 %v2800_v34  ;;  %1018 = vmatpush.msra.mxu1 %v3266_v46 }
 0x1df   :  { %1038 = vmatpush.msra.mxu2 %v3267_v47  ;;  %1058 = vmatpush.msra.mxu3 %v3268_v49 }
 0x23b   :  { %v706_v36 = vpop.f32.mrf.mxu0  ;;  %v726_v38 = vpop.f32.mrf.mxu1 }
 0x23c   :  { %v769_v40 = vadd.f32 %v706_v36, %v3285_v39  ;;  %v770_v42 = vadd.f32 %v726_v38, %v3286_v55  ;;  %v3288_v38 = vld [vmem:[#allocation54_spill] sm:$0xff] }
 0x23e   :  { %v1674_v56 = vmul.f32 -1.442695, %v769_v40  ;;  %v1675_v43 = vmul.f32 -1.442695, %v770_v42 }
 0x240   :  { %1748 = vpow2.f32 %v1674_v56 }
 0x241   :  { %1750 = vpow2.f32 %v1675_v43 }
 0x242   :  { %v766_v44 = vpop.f32.mrf.mxu3  ;;  %v746_v49 = vpop.f32.mrf.mxu2 }
 0x243   :  { %v772_v30 = vadd.f32 %v766_v44, %v3287_v58  ;;  %v771_v40 = vadd.f32 %v746_v49, %v3288_v38 }
 0x245   :  { %v1676_v34 = vmul.f32 -1.442695, %v772_v30 }
 0x246   :  { %v1749_v54 = vpop.eup %1748 }
 0x247   :  { %v1751_v46 = vpop.eup %1750  ;;  %v776_v26 = vadd.f32 1.0, %v1749_v54  ;;  %1752 = vpow2.f32 %v1676_v34 }
 0x248   :  { %v795_v47 = vadd.f32 1.0, %v1751_v46 }
 0x249   :  { %1754 = vrcp.f32 %v776_v26  ;;  %v788_v30 = vand.u32 2147483648, %v776_v26  ;;  %v786_v34 = vand.u32 2147483647, %v776_v26  ;;  %vm782_vm11 = vweird.f32 %v776_v26 }
 0x24a   :  { %1756 = vrcp.f32 %v795_v47  ;;  %v807_v58 = vand.u32 2147483648, %v795_v47  ;;  %v805_v52 = vand.u32 2147483647, %v795_v47  ;;  %vm801_vm12 = vweird.f32 %v795_v47 }
 0x24b   :  { %v789_v49 = vor.u32 1.1754944e-38, %v788_v30  ;;  %vm787_vm15 = vcmp.eq.f32.partialorder %v786_v34, 8.507059e+37 }
 0x24c   :  { %vm806_vm0 = vcmp.eq.f32.partialorder %v805_v52, 8.507059e+37 }
 0x24d   :  { %v1753_v53 = vpop.eup %1752 }
 0x24e   :  { %v815_v36 = vadd.f32 1.0, %v1753_v53 }
 0x24f   :  { %v1755_v39 = vpop.eup %1754 }
 0x250   :  { %v1757_v55 = vpop.eup %1756  ;;  %v778_v42 = vmul.f32 %v1755_v39, %v776_v26  ;;  %1758 = vrcp.f32 %v815_v36  ;;  %vm783_vm9 = vweird.f32 %v1755_v39  ;;  %v827_v30 = vand.u32 2147483648, %v815_v36 }
 0x251   :  { %v797_v56 = vmul.f32 %v1757_v55, %v795_v47  ;;  %1760 = vtanh.f32 %v771_v40  ;;  %vm802_vm10 = vweird.f32 %v1757_v55  ;;  %vm784_vm13 = vmor %vm782_vm11, %vm783_vm9  ;;  %vm821_vm2 = vweird.f32 %v815_v36 }
 0x252   :  { %v779_v43 = vsub.f32 1.0, %v778_v42  ;;  %vm803_vm14 = vmor %vm801_vm12, %vm802_vm10  ;;  %v808_v42 = vor.u32 1.1754944e-38, %v807_v58  ;;  %v828_v34 = vor.u32 1.1754944e-38, %v827_v30  ;;  %v3307_v30 = vld [vmem:[#allocation21_spill] sm:$0xff] }
 0x253   :  { %v798_v44 = vsub.f32 1.0, %v797_v56 }
 0x254   :  { %v780_v54 = vmul.f32 %v1755_v39, %v779_v43 }
 0x255   :  { %v799_v46 = vmul.f32 %v1757_v55, %v798_v44 }
 0x256   :  { %v1759_v15 = vpop.eup %1758  ;;  %v781_v53 = vadd.f32 %v1755_v39, %v780_v54 }
 0x257   :  { %v800_v38 = vadd.f32 %v1757_v55, %v799_v46  ;;  %v817_v51 = vmul.f32 %v1759_v15, %v815_v36  ;;  %v1761_v40 = vpop.eup %1760  ;;  %vm822_vm1 = vweird.f32 %v1759_v15  ;;  %v3296_v46 = vld [vmem:[#allocation26_spill] sm:$0xff] }
 0x258   :  { %v785_v56 = vsel %vm784_vm13, %v1755_v39, %v781_v53  ;;  %v825_v39 = vand.u32 2147483647, %v815_v36  ;;  %vm823_vm3 = vmor %vm821_vm2, %vm822_vm1  ;;  %v3295_v36 = vld [vmem:[#allocation32_spill] sm:$0xff]  ;;  %v2864_v53 = vld [vmem:[#allocation9 + $0x90] sm:$0xff] }
 0x259   :  { %v790_v50 = vsel %vm787_vm15, %v789_v49, %v785_v56  ;;  %v804_v43 = vsel %vm803_vm14, %v1757_v55, %v800_v38  ;;  %v818_v41 = vsub.f32 1.0, %v817_v51  ;;  %3297 = vst [vmem:[#allocation24_spill] sm:$0xff] %v2864_v53  ;;  %v3298_v49 = vld [vmem:[#allocation20_spill] sm:$0xff]  ;;  %v3299_v38 = vld [vmem:[#allocation25_spill] sm:$0xff]  ;;  %v2870_v56 = vld [vmem:[#allocation9 + $0x70] sm:$0xff] }
 0x25a   :  { %v809_v44 = vsel %vm806_vm0, %v808_v42, %v804_v43  ;;  %v832_v37 = vmul.f32 %v1761_v40, %v790_v50  ;;  %vm826_vm4 = vcmp.eq.f32.partialorder %v825_v39, 8.507059e+37  ;;  %v2858_v50 = vld [vmem:[#allocation9 + $0xb0] sm:$0xff]  ;;  %3301 = vst [vmem:[#allocation33_spill] sm:$0xff] %v2870_v56  ;;  %v2873_v40 = vld [vmem:[#allocation9 + $0x78] sm:$0xff]  ;;  %v2887_v39 = vld [vmem:[#allocation9 + $0x28] sm:$0xff] }
 0x25b   :  { %v831_v33 = vmul.f32 %v809_v44, %v2639_v45  ;;  %v819_v54 = vmul.f32 %v1759_v15, %v818_v41  ;;  %v2852_v45 = vld [vmem:[#allocation9 + $0xd0] sm:$0xff]  ;;  %3293 = vst [vmem:[#allocation34_spill] sm:$0xff] %v2858_v50  ;;  %v2877_v44 = vld [vmem:[#allocation9 + $0x48] sm:$0xff] }
 0x25c   :  { %3289 = vst [vmem:[#allocation38_spill] sm:$0xff] %v2852_v45  ;;  %v3292_v41 = vld [vmem:[#allocation19_spill] sm:$0xff]  ;;  %v3303_v43 = vld [vmem:[#allocation30_spill] sm:$0xff] }
 0x25d   :  { %v2811_v26 = vadd.f32 %v832_v37, %v831_v33  ;;  %v820_v47 = vadd.f32 %v1759_v15, %v819_v54  ;;  %v3290_v33 = vld [vmem:[#allocation28_spill] sm:$0xff]  ;;  %v3291_v37 = vld [vmem:[#allocation23_spill] sm:$0xff]  ;;  %3302 = vst [vmem:[#allocation41_spill] sm:$0xff] %v2873_v40 }
 0x25e   :  { %v3300_v42 = vld [vmem:[#allocation35_spill] sm:$0xff]  ;;  %3304 = vst [vmem:[#allocation37_spill] sm:$0xff] %v2877_v44 }
 0x25f   :  { %1762 = vtanh.f32 %v2811_v26  ;;  %v824_v58 = vsel %vm823_vm3, %v1759_v15, %v820_v47  ;;  %v3294_v15 = vld [vmem:[#allocation22_spill] sm:$0xff]  ;;  %v2883_v47 = vld [vmem:[#allocation9 + $0x58] sm:$0xff]  ;;  %3308 = vst [vmem:[#allocation42_spill] sm:$0xff] %v2887_v39 }
 0x260   :  { %v829_v51 = vsel %vm826_vm4, %v828_v34, %v824_v58  ;;  %v2880_v54 = vld [vmem:[#allocation9 + $0x50] sm:$0xff]  ;;  %3306 = vst [vmem:[#allocation36_spill] sm:$0xff] %v2883_v47  ;;  %v2893_v34 = vld [vmem:[#allocation9 + $0x38] sm:$0xff] }
 0x261   :  { %3305 = vst [vmem:[#allocation27_spill] sm:$0xff] %v2880_v54  ;;  %v2890_v58 = vld [vmem:[#allocation9 + $0x30] sm:$0xff] }
 0x262   :  { %3309 = vst [vmem:[#allocation40_spill] sm:$0xff] %v2890_v58 }
 0x263   :  { %3310 = vst [vmem:[#allocation31_spill] sm:$0xff] %v2893_v34 }
 0x265   :  { %v1763_v52 = vpop.eup %1762 }
 0x266   :  { %v835_v55 = vmul.f32 %v1763_v52, %v829_v51  ;;  %v3311_v52 = vld [vmem:[#allocation29_spill] sm:$0xff] }
 0x267   :  { %v2897_v51 = vld [vmem:[#allocation9 + $0x8] sm:$0xff] }
 0x268   :  { %852 = vmatmul.f32.vlgmr.msra.gmra.mxu0 %v835_v55  ;;  %872 = vmatmul.f32.vlgmr.msrb.gmra.mxu1 %v835_v55  ;;  %3312 = vst [vmem:[#allocation39_spill] sm:$0xff] %v2897_v51 }
 0x269   :  { %892 = vmatmul.f32.vlgmr.msrb.gmra.mxu2 %v835_v55  ;;  %912 = vmatmul.f32.vlgmr.msrb.gmra.mxu3 %v835_v55  ;;  %v2900_v55 = vld [vmem:[#allocation9 + $0x10] sm:$0xff] }
 0x26a   :  { %1130 = vmatpush.msra.mxu0 %v2642_v1  ;;  %1150 = vmatpush.msrb.mxu1 %v2645_v59  ;;  %3313 = vst [vmem:[#allocation44_spill] sm:$0xff] %v2900_v55 }
 0x26b   :  { %1170 = vmatpush.msrb.mxu2 %v2648_v60  ;;  %1190 = vmatpush.msrb.mxu3 %v2651_v62 }
 0x26c   :  { %1131 = vmatpush.msra.mxu0 %v2654_v3  ;;  %1151 = vmatpush.msrb.mxu1 %v2657_v10 }
 0x26d   :  { %1171 = vmatpush.msrb.mxu2 %v2660_v5  ;;  %1191 = vmatpush.msrb.mxu3 %v2663_v2 }
 0x26e   :  { %1132 = vmatpush.msra.mxu0 %v2666_v14  ;;  %1152 = vmatpush.msrb.mxu1 %v2669_v13 }
 0x26f   :  { %1172 = vmatpush.msrb.mxu2 %v2672_v8  ;;  %1192 = vmatpush.msrb.mxu3 %v2675_v61 }
 0x270   :  { %1133 = vmatpush.msra.mxu0 %v2678_v12  ;;  %1153 = vmatpush.msrb.mxu1 %v2681_v20 }
 0x271   :  { %1173 = vmatpush.msrb.mxu2 %v2684_v48  ;;  %1193 = vmatpush.msrb.mxu3 %v2687_v35 }
 0x272   :  { %1134 = vmatpush.msra.mxu0 %v2690_v7  ;;  %1154 = vmatpush.msrb.mxu1 %v2693_v57 }
 0x273   :  { %1174 = vmatpush.msrb.mxu2 %v2696_v0  ;;  %1194 = vmatpush.msrb.mxu3 %v2699_v9 }
 0x274   :  { %1135 = vmatpush.msra.mxu0 %v2702_v63  ;;  %1155 = vmatpush.msrb.mxu1 %v2705_v6 }
 0x275   :  { %1175 = vmatpush.msrb.mxu2 %v2708_v18  ;;  %1195 = vmatpush.msrb.mxu3 %v2711_v17 }
 0x276   :  { %1136 = vmatpush.msra.mxu0 %v2714_v11  ;;  %1156 = vmatpush.msrb.mxu1 %v2717_v23 }
 0x277   :  { %1176 = vmatpush.msrb.mxu2 %v2720_v21  ;;  %1196 = vmatpush.msrb.mxu3 %v2723_v4 }
 0x278   :  { %1137 = vmatpush.msra.mxu0 %v2726_v22  ;;  %1157 = vmatpush.msrb.mxu1 %v2729_v16 }
 0x279   :  { %1177 = vmatpush.msrb.mxu2 %v2732_v19  ;;  %1197 = vmatpush.msrb.mxu3 %v2735_v24 }
 0x27a   :  { %1138 = vmatpush.msra.mxu0 %v2738_v25  ;;  %1158 = vmatpush.msrb.mxu1 %v2741_v27 }
 0x27b   :  { %1178 = vmatpush.msrb.mxu2 %v2744_v28  ;;  %1198 = vmatpush.msrb.mxu3 %v2747_v29 }
 0x27c   :  { %1139 = vmatpush.msra.mxu0 %v2750_v31  ;;  %1159 = vmatpush.msrb.mxu1 %v2753_v32 }
 0x27d   :  { %1179 = vmatpush.msrb.mxu2 %v2852_v45  ;;  %1199 = vmatpush.msrb.mxu3 %v3290_v33 }
 0x27e   :  { %1140 = vmatpush.msra.mxu0 %v3291_v37  ;;  %1160 = vmatpush.msrb.mxu1 %v3292_v41 }
 0x27f   :  { %1180 = vmatpush.msrb.mxu2 %v2858_v50  ;;  %1200 = vmatpush.msrb.mxu3 %v3294_v15 }
 0x280   :  { %1141 = vmatpush.msra.mxu0 %v3295_v36  ;;  %1161 = vmatpush.msrb.mxu1 %v3296_v46 }
 0x281   :  { %1181 = vmatpush.msrb.mxu2 %v2864_v53  ;;  %1201 = vmatpush.msrb.mxu3 %v3298_v49 }
 0x282   :  { %1142 = vmatpush.msra.mxu0 %v3299_v38  ;;  %1162 = vmatpush.msrb.mxu1 %v3300_v42 }
 0x283   :  { %1182 = vmatpush.msrb.mxu2 %v2870_v56  ;;  %1202 = vmatpush.msrb.mxu3 %v2873_v40 }
 0x284   :  { %1143 = vmatpush.msra.mxu0 %v3303_v43  ;;  %1163 = vmatpush.msrb.mxu1 %v2877_v44  ;;  %v3316_v44 = vld [vmem:[#allocation57_spill] sm:$0xff] }
 0x285   :  { %1183 = vmatpush.msrb.mxu2 %v2880_v54  ;;  %1203 = vmatpush.msrb.mxu3 %v2883_v47  ;;  %v3315_v47 = vld [vmem:[#allocation52_spill] sm:$0xff] }
 0x286   :  { %1144 = vmatpush.msra.mxu0 %v3307_v30  ;;  %1164 = vmatpush.msrb.mxu1 %v2887_v39  ;;  %v2903_v30 = vld [vmem:[#allocation9 + $0x18] sm:$0xff] }
 0x287   :  { %1184 = vmatpush.msrb.mxu2 %v2890_v58  ;;  %1204 = vmatpush.msrb.mxu3 %v2893_v34  ;;  %3314 = vst [vmem:[#allocation43_spill] sm:$0xff] %v2903_v30 }
 0x288   :  { %1145 = vmatpush.msra.mxu0 %v3311_v52  ;;  %1165 = vmatpush.msrb.mxu1 %v2897_v51  ;;  %v3317_v51 = vld [vmem:[#allocation59_spill] sm:$0xff] }
 0x289   :  { %1185 = vmatpush.msrb.mxu2 %v2900_v55  ;;  %1205 = vmatpush.msrb.mxu3 %v2903_v30 }
 0x2e5   :  { %v853_v39 = vpop.f32.mrf.mxu0  ;;  %v873_v58 = vpop.f32.mrf.mxu1 }
 0x2e6   :  { %v916_v54 = vadd.f32 %v853_v39, %v3315_v47  ;;  %v917_v34 = vadd.f32 %v873_v58, %v3316_v44  ;;  %v3318_v44 = vld [vmem:[#allocation58_spill] sm:$0xff] }
 0x2e8   :  { %v1677_v43 = vmul.f32 -1.442695, %v916_v54  ;;  %v1678_v52 = vmul.f32 -1.442695, %v917_v34 }
 0x2ea   :  { %1764 = vpow2.f32 %v1677_v43 }
 0x2eb   :  { %1766 = vpow2.f32 %v1678_v52 }
 0x2ec   :  { %v913_v40 = vpop.f32.mrf.mxu3  ;;  %v893_v30 = vpop.f32.mrf.mxu2 }
 0x2ed   :  { %v919_v56 = vadd.f32 %v913_v40, %v3317_v51  ;;  %v918_v54 = vadd.f32 %v893_v30, %v3318_v44 }
 0x2ef   :  { %v1679_v42 = vmul.f32 -1.442695, %v919_v56 }
 0x2f0   :  { %v1765_v38 = vpop.eup %1764 }
 0x2f1   :  { %v1767_v55 = vpop.eup %1766  ;;  %v923_v49 = vadd.f32 1.0, %v1765_v38  ;;  %1768 = vpow2.f32 %v1679_v42 }
 0x2f2   :  { %v942_v53 = vadd.f32 1.0, %v1767_v55 }
 0x2f3   :  { %1770 = vrcp.f32 %v923_v49  ;;  %v935_v56 = vand.u32 2147483648, %v923_v49  ;;  %v933_v42 = vand.u32 2147483647, %v923_v49  ;;  %vm929_vm7 = vweird.f32 %v923_v49 }
 0x2f4   :  { %1772 = vrcp.f32 %v942_v53  ;;  %v954_v51 = vand.u32 2147483648, %v942_v53  ;;  %v952_v36 = vand.u32 2147483647, %v942_v53  ;;  %vm948_vm8 = vweird.f32 %v942_v53 }
 0x2f5   :  { %v936_v30 = vor.u32 1.1754944e-38, %v935_v56  ;;  %vm934_vm11 = vcmp.eq.f32.partialorder %v933_v42, 8.507059e+37 }
 0x2f6   :  { %vm953_vm12 = vcmp.eq.f32.partialorder %v952_v36, 8.507059e+37 }
 0x2f7   :  { %v1769_v46 = vpop.eup %1768 }
 0x2f8   :  { %v962_v47 = vadd.f32 1.0, %v1769_v46 }
 0x2f9   :  { %v1771_v39 = vpop.eup %1770 }
 0x2fa   :  { %v1773_v58 = vpop.eup %1772  ;;  %v925_v43 = vmul.f32 %v1771_v39, %v923_v49  ;;  %1774 = vrcp.f32 %v962_v47  ;;  %vm930_vm5 = vweird.f32 %v1771_v39  ;;  %v974_v56 = vand.u32 2147483648, %v962_v47 }
 0x2fb   :  { %v944_v34 = vmul.f32 %v1773_v58, %v942_v53  ;;  %1776 = vtanh.f32 %v918_v54  ;;  %vm949_vm6 = vweird.f32 %v1773_v58  ;;  %vm931_vm9 = vmor %vm929_vm7, %vm930_vm5  ;;  %vm968_vm14 = vweird.f32 %v962_v47 }
 0x2fc   :  { %v926_v52 = vsub.f32 1.0, %v925_v43  ;;  %vm950_vm10 = vmor %vm948_vm8, %vm949_vm6  ;;  %v955_v43 = vor.u32 1.1754944e-38, %v954_v51  ;;  %v975_v42 = vor.u32 1.1754944e-38, %v974_v56  ;;  %v3337_v56 = vld [vmem:[#allocation21_spill] sm:$0xff] }
 0x2fd   :  { %v945_v40 = vsub.f32 1.0, %v944_v34 }
 0x2fe   :  { %v927_v38 = vmul.f32 %v1771_v39, %v926_v52 }
 0x2ff   :  { %v946_v55 = vmul.f32 %v1773_v58, %v945_v40 }
 0x300   :  { %v1775_v15 = vpop.eup %1774  ;;  %v928_v46 = vadd.f32 %v1771_v39, %v927_v38 }
 0x301   :  { %v947_v44 = vadd.f32 %v1773_v58, %v946_v55  ;;  %v964_v50 = vmul.f32 %v1775_v15, %v962_v47  ;;  %v1777_v54 = vpop.eup %1776  ;;  %vm969_vm13 = vweird.f32 %v1775_v15  ;;  %v3326_v55 = vld [vmem:[#allocation26_spill] sm:$0xff] }
 0x302   :  { %v932_v34 = vsel %vm931_vm9, %v1771_v39, %v928_v46  ;;  %v972_v39 = vand.u32 2147483647, %v962_v47  ;;  %vm970_vm15 = vmor %vm968_vm14, %vm969_vm13  ;;  %v3325_v47 = vld [vmem:[#allocation32_spill] sm:$0xff] }
 0x303   :  { %v937_v41 = vsel %vm934_vm11, %v936_v30, %v932_v34  ;;  %v951_v52 = vsel %vm950_vm10, %v1773_v58, %v947_v44  ;;  %v965_v37 = vsub.f32 1.0, %v964_v50  ;;  %v3327_v46 = vld [vmem:[#allocation24_spill] sm:$0xff]  ;;  %v3329_v44 = vld [vmem:[#allocation25_spill] sm:$0xff] }
 0x304   :  { %v956_v40 = vsel %vm953_vm12, %v955_v43, %v951_v52  ;;  %v979_v33 = vmul.f32 %v1777_v54, %v937_v41  ;;  %vm973_vm0 = vcmp.eq.f32.partialorder %v972_v39, 8.507059e+37  ;;  %v3323_v41 = vld [vmem:[#allocation34_spill] sm:$0xff]  ;;  %v3328_v30 = vld [vmem:[#allocation20_spill] sm:$0xff]  ;;  %v3330_v43 = vld [vmem:[#allocation35_spill] sm:$0xff] }
 0x305   :  { %v978_v45 = vmul.f32 %v956_v40, %v2811_v26  ;;  %v966_v38 = vmul.f32 %v1775_v15, %v965_v37  ;;  %v3319_v26 = vld [vmem:[#allocation38_spill] sm:$0xff]  ;;  %v3322_v37 = vld [vmem:[#allocation19_spill] sm:$0xff]  ;;  %v3331_v34 = vld [vmem:[#allocation33_spill] sm:$0xff] }
 0x306   :  { %v3332_v54 = vld [vmem:[#allocation41_spill] sm:$0xff]  ;;  %v3333_v52 = vld [vmem:[#allocation30_spill] sm:$0xff] }
 0x307   :  { %v2911_v49 = vadd.f32 %v979_v33, %v978_v45  ;;  %v967_v53 = vadd.f32 %v1775_v15, %v966_v38  ;;  %v3320_v45 = vld [vmem:[#allocation28_spill] sm:$0xff]  ;;  %v3321_v33 = vld [vmem:[#allocation23_spill] sm:$0xff]  ;;  %v3334_v40 = vld [vmem:[#allocation37_spill] sm:$0xff] }
 0x308   :  { %v3335_v38 = vld [vmem:[#allocation27_spill] sm:$0xff]  ;;  %v3338_v39 = vld [vmem:[#allocation42_spill] sm:$0xff] }
 0x309   :  { %1778 = vtanh.f32 %v2911_v49  ;;  %v971_v51 = vsel %vm970_vm15, %v1775_v15, %v967_v53  ;;  %v3324_v15 = vld [vmem:[#allocation22_spill] sm:$0xff]  ;;  %v3336_v53 = vld [vmem:[#allocation36_spill] sm:$0xff] }
 0x30a   :  { %v976_v50 = vsel %vm973_vm0, %v975_v42, %v971_v51  ;;  %v3339_v51 = vld [vmem:[#allocation40_spill] sm:$0xff]  ;;  %v3340_v42 = vld [vmem:[#allocation31_spill] sm:$0xff] }
 0x30f   :  { %v1779_v36 = vpop.eup %1778 }
 0x310   :  { %v982_v58 = vmul.f32 %v1779_v36, %v976_v50  ;;  %v3341_v36 = vld [vmem:[#allocation29_spill] sm:$0xff]  ;;  %v3342_v50 = vld [vmem:[#allocation39_spill] sm:$0xff] }
 0x312   :  { %999 = vmatmul.f32.vlgmr.msrb.gmra.mxu0 %v982_v58  ;;  %1019 = vmatmul.f32.vlgmr.msra.gmra.mxu1 %v982_v58 }
 0x313   :  { %1039 = vmatmul.f32.vlgmr.msra.gmra.mxu2 %v982_v58  ;;  %1059 = vmatmul.f32.vlgmr.msra.gmra.mxu3 %v982_v58  ;;  %v3343_v58 = vld [vmem:[#allocation44_spill] sm:$0xff] }
 0x314   :  { %1277 = vmatpush.msrb.mxu0 %v2642_v1  ;;  %1297 = vmatpush.msra.mxu1 %v2645_v59 }
 0x315   :  { %1317 = vmatpush.msra.mxu2 %v2648_v60  ;;  %1337 = vmatpush.msra.mxu3 %v2651_v62 }
 0x316   :  { %1278 = vmatpush.msrb.mxu0 %v2654_v3  ;;  %1298 = vmatpush.msra.mxu1 %v2657_v10 }
 0x317   :  { %1318 = vmatpush.msra.mxu2 %v2660_v5  ;;  %1338 = vmatpush.msra.mxu3 %v2663_v2 }
 0x318   :  { %1279 = vmatpush.msrb.mxu0 %v2666_v14  ;;  %1299 = vmatpush.msra.mxu1 %v2669_v13 }
 0x319   :  { %1319 = vmatpush.msra.mxu2 %v2672_v8  ;;  %1339 = vmatpush.msra.mxu3 %v2675_v61 }
 0x31a   :  { %1280 = vmatpush.msrb.mxu0 %v2678_v12  ;;  %1300 = vmatpush.msra.mxu1 %v2681_v20 }
 0x31b   :  { %1320 = vmatpush.msra.mxu2 %v2684_v48  ;;  %1340 = vmatpush.msra.mxu3 %v2687_v35 }
 0x31c   :  { %1281 = vmatpush.msrb.mxu0 %v2690_v7  ;;  %1301 = vmatpush.msra.mxu1 %v2693_v57 }
 0x31d   :  { %1321 = vmatpush.msra.mxu2 %v2696_v0  ;;  %1341 = vmatpush.msra.mxu3 %v2699_v9 }
 0x31e   :  { %1282 = vmatpush.msrb.mxu0 %v2702_v63  ;;  %1302 = vmatpush.msra.mxu1 %v2705_v6 }
 0x31f   :  { %1322 = vmatpush.msra.mxu2 %v2708_v18  ;;  %1342 = vmatpush.msra.mxu3 %v2711_v17 }
 0x320   :  { %1283 = vmatpush.msrb.mxu0 %v2714_v11  ;;  %1303 = vmatpush.msra.mxu1 %v2717_v23 }
 0x321   :  { %1323 = vmatpush.msra.mxu2 %v2720_v21  ;;  %1343 = vmatpush.msra.mxu3 %v2723_v4 }
 0x322   :  { %1284 = vmatpush.msrb.mxu0 %v2726_v22  ;;  %1304 = vmatpush.msra.mxu1 %v2729_v16 }
 0x323   :  { %1324 = vmatpush.msra.mxu2 %v2732_v19  ;;  %1344 = vmatpush.msra.mxu3 %v2735_v24 }
 0x324   :  { %1285 = vmatpush.msrb.mxu0 %v2738_v25  ;;  %1305 = vmatpush.msra.mxu1 %v2741_v27 }
 0x325   :  { %1325 = vmatpush.msra.mxu2 %v2744_v28  ;;  %1345 = vmatpush.msra.mxu3 %v2747_v29 }
 0x326   :  { %1286 = vmatpush.msrb.mxu0 %v2750_v31  ;;  %1306 = vmatpush.msra.mxu1 %v2753_v32 }
 0x327   :  { %1326 = vmatpush.msra.mxu2 %v3319_v26  ;;  %1346 = vmatpush.msra.mxu3 %v3320_v45 }
 0x328   :  { %1287 = vmatpush.msrb.mxu0 %v3321_v33  ;;  %1307 = vmatpush.msra.mxu1 %v3322_v37 }
 0x329   :  { %1327 = vmatpush.msra.mxu2 %v3323_v41  ;;  %1347 = vmatpush.msra.mxu3 %v3324_v15 }
 0x32a   :  { %1288 = vmatpush.msrb.mxu0 %v3325_v47  ;;  %1308 = vmatpush.msra.mxu1 %v3326_v55 }
 0x32b   :  { %1328 = vmatpush.msra.mxu2 %v3327_v46  ;;  %1348 = vmatpush.msra.mxu3 %v3328_v30 }
 0x32c   :  { %1289 = vmatpush.msrb.mxu0 %v3329_v44  ;;  %1309 = vmatpush.msra.mxu1 %v3330_v43 }
 0x32d   :  { %1329 = vmatpush.msra.mxu2 %v3331_v34  ;;  %1349 = vmatpush.msra.mxu3 %v3332_v54  ;;  %v3345_v54 = vld [vmem:[#allocation56_spill] sm:$0xff] }
 0x32e   :  { %1290 = vmatpush.msrb.mxu0 %v3333_v52  ;;  %1310 = vmatpush.msra.mxu1 %v3334_v40  ;;  %v3344_v52 = vld [vmem:[#allocation43_spill] sm:$0xff]  ;;  %v3346_v34 = vld [vmem:[#allocation60_spill] sm:$0xff] }
 0x32f   :  { %1330 = vmatpush.msra.mxu2 %v3335_v38  ;;  %1350 = vmatpush.msra.mxu3 %v3336_v53 }
 0x330   :  { %1291 = vmatpush.msrb.mxu0 %v3337_v56  ;;  %1311 = vmatpush.msra.mxu1 %v3338_v39 }
 0x331   :  { %1331 = vmatpush.msra.mxu2 %v3339_v51  ;;  %1351 = vmatpush.msra.mxu3 %v3340_v42  ;;  %v3347_v42 = vld [vmem:[#allocation62_spill] sm:$0xff] }
 0x332   :  { %1292 = vmatpush.msrb.mxu0 %v3341_v36  ;;  %1312 = vmatpush.msra.mxu1 %v3342_v50 }
 0x333   :  { %1332 = vmatpush.msra.mxu2 %v3343_v58  ;;  %1352 = vmatpush.msra.mxu3 %v3344_v52 }
 0x38f   :  { %v1000_v40 = vpop.f32.mrf.mxu0  ;;  %v1020_v38 = vpop.f32.mrf.mxu1 }
 0x390   :  { %v1063_v53 = vadd.f32 %v1000_v40, %v3345_v54  ;;  %v1064_v56 = vadd.f32 %v1020_v38, %v3346_v34  ;;  %v3348_v34 = vld [vmem:[#allocation61_spill] sm:$0xff] }
 0x392   :  { %v1680_v43 = vmul.f32 -1.442695, %v1063_v53  ;;  %v1681_v39 = vmul.f32 -1.442695, %v1064_v56 }
 0x394   :  { %1780 = vpow2.f32 %v1680_v43 }
 0x395   :  { %1782 = vpow2.f32 %v1681_v39 }
 0x396   :  { %v1060_v51 = vpop.f32.mrf.mxu3  ;;  %v1040_v52 = vpop.f32.mrf.mxu2 }
 0x397   :  { %v1066_v44 = vadd.f32 %v1060_v51, %v3347_v42  ;;  %v1065_v38 = vadd.f32 %v1040_v52, %v3348_v34 }
 0x399   :  { %v1682_v36 = vmul.f32 -1.442695, %v1066_v44 }
 0x39a   :  { %v1781_v30 = vpop.eup %1780 }
 0x39b   :  { %v1783_v50 = vpop.eup %1782  ;;  %v1070_v46 = vadd.f32 1.0, %v1781_v30  ;;  %1784 = vpow2.f32 %v1682_v36 }
 0x39c   :  { %v1089_v58 = vadd.f32 1.0, %v1783_v50 }
 0x39d   :  { %1786 = vrcp.f32 %v1070_v46  ;;  %v1082_v44 = vand.u32 2147483648, %v1070_v46  ;;  %v1080_v36 = vand.u32 2147483647, %v1070_v46  ;;  %vm1076_vm3 = vweird.f32 %v1070_v46 }
 0x39e   :  { %1788 = vrcp.f32 %v1089_v58  ;;  %v1101_v42 = vand.u32 2147483648, %v1089_v58  ;;  %v1099_v47 = vand.u32 2147483647, %v1089_v58  ;;  %vm1095_vm4 = vweird.f32 %v1089_v58 }
 0x39f   :  { %v1083_v52 = vor.u32 1.1754944e-38, %v1082_v44  ;;  %vm1081_vm7 = vcmp.eq.f32.partialorder %v1080_v36, 8.507059e+37 }
 0x3a0   :  { %vm1100_vm8 = vcmp.eq.f32.partialorder %v1099_v47, 8.507059e+37 }
 0x3a1   :  { %v1785_v55 = vpop.eup %1784 }
 0x3a2   :  { %v1109_v54 = vadd.f32 1.0, %v1785_v55 }
 0x3a3   :  { %v1787_v40 = vpop.eup %1786 }
 0x3a4   :  { %v1789_v53 = vpop.eup %1788  ;;  %v1072_v43 = vmul.f32 %v1787_v40, %v1070_v46  ;;  %1790 = vrcp.f32 %v1109_v54  ;;  %vm1077_vm1 = vweird.f32 %v1787_v40  ;;  %v1121_v44 = vand.u32 2147483648, %v1109_v54 }
 0x3a5   :  { %v1091_v56 = vmul.f32 %v1789_v53, %v1089_v58  ;;  %1792 = vtanh.f32 %v1065_v38  ;;  %vm1096_vm2 = vweird.f32 %v1789_v53  ;;  %vm1078_vm5 = vmor %vm1076_vm3, %vm1077_vm1  ;;  %vm1115_vm10 = vweird.f32 %v1109_v54 }
 0x3a6   :  { %v1073_v39 = vsub.f32 1.0, %v1072_v43  ;;  %vm1097_vm6 = vmor %vm1095_vm4, %vm1096_vm2  ;;  %v1102_v43 = vor.u32 1.1754944e-38, %v1101_v42  ;;  %v1122_v36 = vor.u32 1.1754944e-38, %v1121_v44 }
 0x3a7   :  { %v1092_v51 = vsub.f32 1.0, %v1091_v56 }
 0x3a8   :  { %v1074_v30 = vmul.f32 %v1787_v40, %v1073_v39 }
 0x3a9   :  { %v1093_v50 = vmul.f32 %v1789_v53, %v1092_v51 }
 0x3aa   :  { %v1791_v15 = vpop.eup %1790  ;;  %v1075_v55 = vadd.f32 %v1787_v40, %v1074_v30 }
 0x3ab   :  { %v1094_v34 = vadd.f32 %v1789_v53, %v1093_v50  ;;  %v1111_v41 = vmul.f32 %v1791_v15, %v1109_v54  ;;  %v1793_v38 = vpop.eup %1792  ;;  %vm1116_vm9 = vweird.f32 %v1791_v15 }
 0x3ac   :  { %v1079_v56 = vsel %vm1078_vm5, %v1787_v40, %v1075_v55  ;;  %v1119_v40 = vand.u32 2147483647, %v1109_v54  ;;  %vm1117_vm11 = vmor %vm1115_vm10, %vm1116_vm9  ;;  %v3378_v55 = vld [vmem:[#allocation64_spill] sm:$0xff] }
 0x3ad   :  { %v1084_v37 = vsel %vm1081_vm7, %v1083_v52, %v1079_v56  ;;  %v1098_v39 = vsel %vm1097_vm6, %v1789_v53, %v1094_v34  ;;  %v1112_v33 = vsub.f32 1.0, %v1111_v41 }
 0x3ae   :  { %v1103_v51 = vsel %vm1100_vm8, %v1102_v43, %v1098_v39  ;;  %v1126_v45 = vmul.f32 %v1793_v38, %v1084_v37  ;;  %vm1120_vm12 = vcmp.eq.f32.partialorder %v1119_v40, 8.507059e+37 }
 0x3af   :  { %v1125_v26 = vmul.f32 %v1103_v51, %v2911_v49  ;;  %v1113_v30 = vmul.f32 %v1791_v15, %v1112_v33 }
 0x3b1   :  { %v2983_v46 = vadd.f32 %v1126_v45, %v1125_v26  ;;  %v1114_v58 = vadd.f32 %v1791_v15, %v1113_v30 }
 0x3b3   :  { %1794 = vtanh.f32 %v2983_v46  ;;  %v1118_v42 = vsel %vm1117_vm11, %v1791_v15, %v1114_v58 }
 0x3b4   :  { %v1123_v41 = vsel %vm1120_vm12, %v1122_v36, %v1118_v42 }
 0x3b9   :  { %v1795_v47 = vpop.eup %1794 }
 0x3ba   :  { %v1129_v53 = vmul.f32 %v1795_v47, %v1123_v41 }
 0x3bc   :  { %1146 = vmatmul.f32.vlgmr.msra.gmra.mxu0 %v1129_v53  ;;  %1166 = vmatmul.f32.vlgmr.msrb.gmra.mxu1 %v1129_v53 }
 0x3bd   :  { %1186 = vmatmul.f32.vlgmr.msrb.gmra.mxu2 %v1129_v53  ;;  %1206 = vmatmul.f32.vlgmr.msrb.gmra.mxu3 %v1129_v53 }
 0x3be   :  { %1424 = vmatpush.msra.mxu0 %v2642_v1  ;;  %1444 = vmatpush.msrb.mxu1 %v2645_v59  ;;  %v3349_v1 = vld [vmem:[#allocation38_spill] sm:$0xff]  ;;  %v3350_v59 = vld [vmem:[#allocation28_spill] sm:$0xff] }
 0x3bf   :  { %1464 = vmatpush.msrb.mxu2 %v2648_v60  ;;  %1484 = vmatpush.msrb.mxu3 %v2651_v62  ;;  %v3351_v60 = vld [vmem:[#allocation23_spill] sm:$0xff] }
 0x3c0   :  { %1425 = vmatpush.msra.mxu0 %v2654_v3  ;;  %1445 = vmatpush.msrb.mxu1 %v2657_v10  ;;  %v3352_v62 = vld [vmem:[#allocation19_spill] sm:$0xff]  ;;  %v3353_v3 = vld [vmem:[#allocation34_spill] sm:$0xff] }
 0x3c1   :  { %1465 = vmatpush.msrb.mxu2 %v2660_v5  ;;  %1485 = vmatpush.msrb.mxu3 %v2663_v2  ;;  %v3354_v10 = vld [vmem:[#allocation22_spill] sm:$0xff]  ;;  %v3355_v5 = vld [vmem:[#allocation32_spill] sm:$0xff] }
 0x3c2   :  { %1426 = vmatpush.msra.mxu0 %v2666_v14  ;;  %1446 = vmatpush.msrb.mxu1 %v2669_v13  ;;  %v3356_v2 = vld [vmem:[#allocation26_spill] sm:$0xff]  ;;  %v3357_v14 = vld [vmem:[#allocation24_spill] sm:$0xff] }
 0x3c3   :  { %1466 = vmatpush.msrb.mxu2 %v2672_v8  ;;  %1486 = vmatpush.msrb.mxu3 %v2675_v61  ;;  %v3358_v13 = vld [vmem:[#allocation20_spill] sm:$0xff]  ;;  %v3359_v8 = vld [vmem:[#allocation25_spill] sm:$0xff]  ;;  %v3360_v61 = vld [vmem:[#allocation35_spill] sm:$0xff] }
 0x3c4   :  { %1427 = vmatpush.msra.mxu0 %v2678_v12  ;;  %1447 = vmatpush.msrb.mxu1 %v2681_v20  ;;  %v3361_v12 = vld [vmem:[#allocation33_spill] sm:$0xff] }
 0x3c5   :  { %1467 = vmatpush.msrb.mxu2 %v2684_v48  ;;  %1487 = vmatpush.msrb.mxu3 %v2687_v35  ;;  %v3362_v20 = vld [vmem:[#allocation41_spill] sm:$0xff]  ;;  %v3363_v48 = vld [vmem:[#allocation30_spill] sm:$0xff] }
 0x3c6   :  { %1428 = vmatpush.msra.mxu0 %v2690_v7  ;;  %1448 = vmatpush.msrb.mxu1 %v2693_v57  ;;  %v3364_v35 = vld [vmem:[#allocation37_spill] sm:$0xff]  ;;  %v3365_v7 = vld [vmem:[#allocation27_spill] sm:$0xff]  ;;  %v3366_v57 = vld [vmem:[#allocation36_spill] sm:$0xff] }
 0x3c7   :  { %1468 = vmatpush.msrb.mxu2 %v2696_v0  ;;  %1488 = vmatpush.msrb.mxu3 %v2699_v9  ;;  %v3367_v0 = vld [vmem:[#allocation21_spill] sm:$0xff]  ;;  %v3368_v9 = vld [vmem:[#allocation42_spill] sm:$0xff] }
 0x3c8   :  { %1429 = vmatpush.msra.mxu0 %v2702_v63  ;;  %1449 = vmatpush.msrb.mxu1 %v2705_v6  ;;  %v3369_v63 = vld [vmem:[#allocation40_spill] sm:$0xff]  ;;  %v3370_v6 = vld [vmem:[#allocation31_spill] sm:$0xff] }
 0x3c9   :  { %1469 = vmatpush.msrb.mxu2 %v2708_v18  ;;  %1489 = vmatpush.msrb.mxu3 %v2711_v17  ;;  %v3371_v18 = vld [vmem:[#allocation29_spill] sm:$0xff]  ;;  %v3372_v17 = vld [vmem:[#allocation39_spill] sm:$0xff] }
 0x3ca   :  { %1430 = vmatpush.msra.mxu0 %v2714_v11  ;;  %1450 = vmatpush.msrb.mxu1 %v2717_v23  ;;  %v3373_v11 = vld [vmem:[#allocation44_spill] sm:$0xff]  ;;  %v3374_v23 = vld [vmem:[#allocation43_spill] sm:$0xff] }
 0x3cb   :  { %1470 = vmatpush.msrb.mxu2 %v2720_v21  ;;  %1490 = vmatpush.msrb.mxu3 %v2723_v4 }
 0x3cc   :  { %1431 = vmatpush.msra.mxu0 %v2726_v22  ;;  %1451 = vmatpush.msrb.mxu1 %v2729_v16  ;;  %v3375_v22 = vld [vmem:[#allocation18_spill] sm:$0xff] }
 0x3cd   :  { %1471 = vmatpush.msrb.mxu2 %v2732_v19  ;;  %1491 = vmatpush.msrb.mxu3 %v2735_v24  ;;  %v3376_v19 = vld [vmem:[#allocation63_spill] sm:$0xff] }
 0x3ce   :  { %1432 = vmatpush.msra.mxu0 %v2738_v25  ;;  %1452 = vmatpush.msrb.mxu1 %v2741_v27 }
 0x3cf   :  { %1472 = vmatpush.msrb.mxu2 %v2744_v28  ;;  %1492 = vmatpush.msrb.mxu3 %v2747_v29  ;;  %v3377_v29 = vld [vmem:[#allocation65_spill] sm:$0xff] }
 0x3d0   :  { %1433 = vmatpush.msra.mxu0 %v2750_v31  ;;  %1453 = vmatpush.msrb.mxu1 %v2753_v32 }
 0x3d1   :  { %1473 = vmatpush.msrb.mxu2 %v3349_v1  ;;  %1493 = vmatpush.msrb.mxu3 %v3350_v59 }
 0x3d2   :  { %1434 = vmatpush.msra.mxu0 %v3351_v60  ;;  %1454 = vmatpush.msrb.mxu1 %v3352_v62 }
 0x3d3   :  { %1474 = vmatpush.msrb.mxu2 %v3353_v3  ;;  %1494 = vmatpush.msrb.mxu3 %v3354_v10 }
 0x3d4   :  { %1435 = vmatpush.msra.mxu0 %v3355_v5  ;;  %1455 = vmatpush.msrb.mxu1 %v3356_v2 }
 0x3d5   :  { %1475 = vmatpush.msrb.mxu2 %v3357_v14  ;;  %1495 = vmatpush.msrb.mxu3 %v3358_v13 }
 0x3d6   :  { %1436 = vmatpush.msra.mxu0 %v3359_v8  ;;  %1456 = vmatpush.msrb.mxu1 %v3360_v61 }
 0x3d7   :  { %1476 = vmatpush.msrb.mxu2 %v3361_v12  ;;  %1496 = vmatpush.msrb.mxu3 %v3362_v20 }
 0x3d8   :  { %1437 = vmatpush.msra.mxu0 %v3363_v48  ;;  %1457 = vmatpush.msrb.mxu1 %v3364_v35 }
 0x3d9   :  { %1477 = vmatpush.msrb.mxu2 %v3365_v7  ;;  %1497 = vmatpush.msrb.mxu3 %v3366_v57 }
 0x3da   :  { %1438 = vmatpush.msra.mxu0 %v3367_v0  ;;  %1458 = vmatpush.msrb.mxu1 %v3368_v9 }
 0x3db   :  { %1478 = vmatpush.msrb.mxu2 %v3369_v63  ;;  %1498 = vmatpush.msrb.mxu3 %v3370_v6  ;;  %v3379_v6 = vld [vmem:[#allocation45_spill] sm:$0xff] }
 0x3dc   :  { %1439 = vmatpush.msra.mxu0 %v3371_v18  ;;  %1459 = vmatpush.msrb.mxu1 %v3372_v17  ;;  %v3380_v17 = vld [vmem:[#allocation66_spill] sm:$0xff] }
 0x3dd   :  { %1479 = vmatpush.msrb.mxu2 %v3373_v11  ;;  %1499 = vmatpush.msrb.mxu3 %v3374_v23 }
 0x439   :  { %v1147_v21 = vpop.f32.mrf.mxu0  ;;  %v1167_v4 = vpop.f32.mrf.mxu1 }
 0x43a   :  { %v1210_v16 = vadd.f32 %v1147_v21, %v3375_v22  ;;  %v1211_v24 = vadd.f32 %v1167_v4, %v3376_v19  ;;  %v3381_v22 = vld [vmem:[#allocation68_spill] sm:$0xff] }
 0x43c   :  { %v1683_v25 = vmul.f32 -1.442695, %v1210_v16  ;;  %v1684_v27 = vmul.f32 -1.442695, %v1211_v24 }
 0x43e   :  { %1796 = vpow2.f32 %v1683_v25 }
 0x43f   :  { %1798 = vpow2.f32 %v1684_v27 }
 0x440   :  { %v1207_v28 = vpop.f32.mrf.mxu3  ;;  %v1187_v37 = vpop.f32.mrf.mxu2 }
 0x441   :  { %v1213_v31 = vadd.f32 %v1207_v28, %v3377_v29  ;;  %v1212_v52 = vadd.f32 %v1187_v37, %v3378_v55 }
 0x443   :  { %v1685_v32 = vmul.f32 -1.442695, %v1213_v31 }
 0x444   :  { %v1797_v49 = vpop.eup %1796 }
 0x445   :  { %v1799_v26 = vpop.eup %1798  ;;  %v1217_v45 = vadd.f32 1.0, %v1797_v49  ;;  %1800 = vpow2.f32 %v1685_v32 }
 0x446   :  { %v1236_v33 = vadd.f32 1.0, %v1799_v26  ;;  %v3382_v26 = vld [vmem:[#allocation67_spill] sm:$0xff] }
 0x447   :  { %1802 = vrcp.f32 %v1217_v45  ;;  %v1229_v51 = vand.u32 2147483648, %v1217_v45  ;;  %v1227_v44 = vand.u32 2147483647, %v1217_v45  ;;  %vm1223_vm15 = vweird.f32 %v1217_v45 }
 0x448   :  { %1804 = vrcp.f32 %v1236_v33  ;;  %v1248_v30 = vand.u32 2147483648, %v1236_v33  ;;  %v1246_v42 = vand.u32 2147483647, %v1236_v33  ;;  %vm1242_vm0 = vweird.f32 %v1236_v33 }
 0x449   :  { %v1230_v41 = vor.u32 1.1754944e-38, %v1229_v51  ;;  %vm1228_vm3 = vcmp.eq.f32.partialorder %v1227_v44, 8.507059e+37 }
 0x44a   :  { %v1249_v59 = vor.u32 1.1754944e-38, %v1248_v30  ;;  %vm1247_vm4 = vcmp.eq.f32.partialorder %v1246_v42, 8.507059e+37 }
 0x44b   :  { %v1801_v15 = vpop.eup %1800 }
 0x44c   :  { %v1256_v54 = vadd.f32 1.0, %v1801_v15 }
 0x44d   :  { %v1803_v50 = vpop.eup %1802 }
 0x44e   :  { %v1805_v34 = vpop.eup %1804  ;;  %v1219_v43 = vmul.f32 %v1803_v50, %v1217_v45  ;;  %1806 = vrcp.f32 %v1256_v54  ;;  %vm1224_vm13 = vweird.f32 %v1803_v50  ;;  %v1268_v20 = vand.u32 2147483648, %v1256_v54 }
 0x44f   :  { %v1238_v56 = vmul.f32 %v1805_v34, %v1236_v33  ;;  %1808 = vtanh.f32 %v1212_v52  ;;  %vm1243_vm14 = vweird.f32 %v1805_v34  ;;  %vm1225_vm1 = vmor %vm1223_vm15, %vm1224_vm13  ;;  %vm1262_vm6 = vweird.f32 %v1256_v54 }
 0x450   :  { %v1220_v38 = vsub.f32 1.0, %v1219_v43  ;;  %vm1244_vm2 = vmor %vm1242_vm0, %vm1243_vm14  ;;  %v1266_v48 = vand.u32 2147483647, %v1256_v54  ;;  %v1269_v7 = vor.u32 1.1754944e-38, %v1268_v20 }
 0x451   :  { %v1239_v39 = vsub.f32 1.0, %v1238_v56 }
 0x452   :  { %v1221_v58 = vmul.f32 %v1803_v50, %v1220_v38  ;;  %vm1267_vm8 = vcmp.eq.f32.partialorder %v1266_v48, 8.507059e+37  ;;  %v1590_v48 = vld [vmem:[#allocation12 + $0x70] sm:$0xff] }
 0x453   :  { %v1240_v40 = vmul.f32 %v1805_v34, %v1239_v39 }
 0x454   :  { %v1807_v36 = vpop.eup %1806  ;;  %v1222_v47 = vadd.f32 %v1803_v50, %v1221_v58 }
 0x455   :  { %v1241_v53 = vadd.f32 %v1805_v34, %v1240_v40  ;;  %v1258_v1 = vmul.f32 %v1807_v36, %v1256_v54  ;;  %v1809_v62 = vpop.eup %1808  ;;  %vm1263_vm5 = vweird.f32 %v1807_v36 }
 0x456   :  { %v1226_v60 = vsel %vm1225_vm1, %v1803_v50, %v1222_v47  ;;  %vm1264_vm7 = vmor %vm1262_vm6, %vm1263_vm5 }
 0x457   :  { %v1231_v3 = vsel %vm1228_vm3, %v1230_v41, %v1226_v60  ;;  %v1245_v10 = vsel %vm1244_vm2, %v1805_v34, %v1241_v53  ;;  %v1259_v5 = vsub.f32 1.0, %v1258_v1 }
 0x458   :  { %v1250_v2 = vsel %vm1247_vm4, %v1249_v59, %v1245_v10  ;;  %v1273_v14 = vmul.f32 %v1809_v62, %v1231_v3 }
 0x459   :  { %v1272_v13 = vmul.f32 %v1250_v2, %v2983_v46  ;;  %v1260_v8 = vmul.f32 %v1807_v36, %v1259_v5 }
 0x45b   :  { %v3055_v61 = vadd.f32 %v1273_v14, %v1272_v13  ;;  %v1261_v12 = vadd.f32 %v1807_v36, %v1260_v8 }
 0x45d   :  { %1810 = vtanh.f32 %v3055_v61  ;;  %v1265_v35 = vsel %vm1264_vm7, %v1807_v36, %v1261_v12 }
 0x45e   :  { %v1270_v0 = vsel %vm1267_vm8, %v1269_v7, %v1265_v35  ;;  %v1589_v35 = vld [vmem:[#allocation12 + $0x68] sm:$0xff]  ;;  %v1588_v7 = vld [vmem:[#allocation12 + $0x60] sm:$0xff] }
 0x463   :  { %v1811_v57 = vpop.eup %1810 }
 0x464   :  { %v1276_v9 = vmul.f32 %v1811_v57, %v1270_v0  ;;  %v1587_v57 = vld [vmem:[#allocation12 + $0x58] sm:$0xff]  ;;  %v1586_v0 = vld [vmem:[#allocation12 + $0x50] sm:$0xff] }
 0x466   :  { %1293 = vmatmul.f32.vlgmr.msrb.gmra.mxu0 %v1276_v9  ;;  %1313 = vmatmul.f32.vlgmr.msra.gmra.mxu1 %v1276_v9 }
 0x467   :  { %1333 = vmatmul.f32.vlgmr.msra.gmra.mxu2 %v1276_v9  ;;  %1353 = vmatmul.f32.vlgmr.msra.gmra.mxu3 %v1276_v9  ;;  %v1585_v9 = vld [vmem:[#allocation12 + $0x48] sm:$0xff] }
 0x4e3   :  { %v1294_v46 = vpop.f32.mrf.mxu0  ;;  %v1314_v63 = vpop.f32.mrf.mxu1 }
 0x4e4   :  { %v1357_v18 = vadd.f32 %v1294_v46, %v3379_v6  ;;  %v1358_v11 = vadd.f32 %v1314_v63, %v3380_v17  ;;  %v1584_v46 = vld [vmem:[#allocation12 + $0x40] sm:$0xff]  ;;  %v1583_v63 = vld [vmem:[#allocation12 + $0x38] sm:$0xff]  ;;  %v1582_v6 = vld [vmem:[#allocation12 + $0x30] sm:$0xff] }
 0x4e6   :  { %v1686_v23 = vmul.f32 -1.442695, %v1357_v18  ;;  %v1687_v21 = vmul.f32 -1.442695, %v1358_v11  ;;  %v3383_v11 = vld [vmem:[#allocation46_spill] sm:$0xff] }
 0x4e8   :  { %1812 = vpow2.f32 %v1686_v23 }
 0x4e9   :  { %1814 = vpow2.f32 %v1687_v21  ;;  %v3384_v21 = vld [vmem:[#allocation69_spill] sm:$0xff] }
 0x4ea   :  { %v1354_v4 = vpop.f32.mrf.mxu3  ;;  %v1334_v29 = vpop.f32.mrf.mxu2 }
 0x4eb   :  { %v1360_v16 = vadd.f32 %v1354_v4, %v3381_v22  ;;  %v1359_v45 = vadd.f32 %v1334_v29, %v3382_v26  ;;  %v1581_v22 = vld [vmem:[#allocation12 + $0x28] sm:$0xff] }
 0x4ec   :  { %v1577_v29 = vld [vmem:[#allocation12 + $0x8] sm:$0xff] }
 0x4ed   :  { %v1688_v19 = vmul.f32 -1.442695, %v1360_v16 }
 0x4ee   :  { %v1813_v24 = vpop.eup %1812 }
 0x4ef   :  { %v1815_v25 = vpop.eup %1814  ;;  %v1364_v27 = vadd.f32 1.0, %v1813_v24  ;;  %1816 = vpow2.f32 %v1688_v19  ;;  %v1580_v24 = vld [vmem:[#allocation12 + $0x20] sm:$0xff] }
 0x4f0   :  { %v1383_v28 = vadd.f32 1.0, %v1815_v25  ;;  %v1579_v25 = vld [vmem:[#allocation12 + $0x18] sm:$0xff] }
 0x4f1   :  { %1818 = vrcp.f32 %v1364_v27  ;;  %v1376_v55 = vand.u32 2147483648, %v1364_v27  ;;  %v1374_v43 = vand.u32 2147483647, %v1364_v27  ;;  %vm1370_vm11 = vweird.f32 %v1364_v27 }
 0x4f2   :  { %1820 = vrcp.f32 %v1383_v28  ;;  %v1395_v52 = vand.u32 2147483648, %v1383_v28  ;;  %v1393_v38 = vand.u32 2147483647, %v1383_v28  ;;  %vm1389_vm12 = vweird.f32 %v1383_v28 }
 0x4f3   :  { %v1377_v30 = vor.u32 1.1754944e-38, %v1376_v55  ;;  %vm1375_vm15 = vcmp.eq.f32.partialorder %v1374_v43, 8.507059e+37 }
 0x4f4   :  { %v1396_v40 = vor.u32 1.1754944e-38, %v1395_v52  ;;  %vm1394_vm0 = vcmp.eq.f32.partialorder %v1393_v38, 8.507059e+37 }
 0x4f5   :  { %v1817_v31 = vpop.eup %1816 }
 0x4f6   :  { %v1403_v32 = vadd.f32 1.0, %v1817_v31  ;;  %v3385_v31 = vld [vmem:[#allocation71_spill] sm:$0xff] }
 0x4f7   :  { %v1819_v49 = vpop.eup %1818 }
 0x4f8   :  { %v1821_v33 = vpop.eup %1820  ;;  %v1366_v37 = vmul.f32 %v1819_v49, %v1364_v27  ;;  %1822 = vrcp.f32 %v1403_v32  ;;  %vm1371_vm9 = vweird.f32 %v1819_v49  ;;  %v1415_v5 = vand.u32 2147483648, %v1403_v32  ;;  %v1578_v27 = vld [vmem:[#allocation12 + $0x10] sm:$0xff] }
 0x4f9   :  { %v1385_v15 = vmul.f32 %v1821_v33, %v1383_v28  ;;  %1824 = vtanh.f32 %v1359_v45  ;;  %vm1390_vm10 = vweird.f32 %v1821_v33  ;;  %vm1372_vm13 = vmor %vm1370_vm11, %vm1371_vm9  ;;  %vm1409_vm2 = vweird.f32 %v1403_v32 }
 0x4fa   :  { %v1367_v54 = vsub.f32 1.0, %v1366_v37  ;;  %vm1391_vm14 = vmor %vm1389_vm12, %vm1390_vm10  ;;  %v1413_v2 = vand.u32 2147483647, %v1403_v32  ;;  %v1416_v13 = vor.u32 1.1754944e-38, %v1415_v5 }
 0x4fb   :  { %v1386_v50 = vsub.f32 1.0, %v1385_v15 }
 0x4fc   :  { %v1368_v34 = vmul.f32 %v1819_v49, %v1367_v54  ;;  %vm1414_vm4 = vcmp.eq.f32.partialorder %v1413_v2, 8.507059e+37 }
 0x4fd   :  { %v1387_v56 = vmul.f32 %v1821_v33, %v1386_v50 }
 0x4fe   :  { %v1823_v39 = vpop.eup %1822  ;;  %v1369_v51 = vadd.f32 %v1819_v49, %v1368_v34  ;;  %v3386_v34 = vld [vmem:[#allocation70_spill] sm:$0xff] }
 0x4ff   :  { %v1388_v58 = vadd.f32 %v1821_v33, %v1387_v56  ;;  %v1405_v44 = vmul.f32 %v1823_v39, %v1403_v32  ;;  %v1825_v36 = vpop.eup %1824  ;;  %vm1410_vm1 = vweird.f32 %v1823_v39 }
 0x500   :  { %v1373_v42 = vsel %vm1372_vm13, %v1819_v49, %v1369_v51  ;;  %vm1411_vm3 = vmor %vm1409_vm2, %vm1410_vm1  ;;  %v1576_v49 = vld [vmem:[#allocation12] sm:$0xff] }
 0x501   :  { %v1378_v47 = vsel %vm1375_vm15, %v1377_v30, %v1373_v42  ;;  %v1392_v41 = vsel %vm1391_vm14, %v1821_v33, %v1388_v58  ;;  %v1406_v53 = vsub.f32 1.0, %v1405_v44 }
 0x502   :  { %v1397_v1 = vsel %vm1394_vm0, %v1396_v40, %v1392_v41  ;;  %v1420_v59 = vmul.f32 %v1825_v36, %v1378_v47 }
 0x503   :  { %v1419_v60 = vmul.f32 %v1397_v1, %v3055_v61  ;;  %v1407_v62 = vmul.f32 %v1823_v39, %v1406_v53  ;;  %v1591_v61 = vld [vmem:[#allocation12 + $0x78] sm:$0xff] }
 0x504   :  { %1596 = vmatpush.msrb.mxu0 %v1591_v61 }
 0x505   :  { %v3063_v3 = vadd.f32 %v1420_v59, %v1419_v60  ;;  %v1408_v10 = vadd.f32 %v1823_v39, %v1407_v62 }
 0x506   :  { %1597 = vmatpush.msrb.mxu0 %v1590_v48 }
 0x507   :  { %1826 = vtanh.f32 %v3063_v3  ;;  %v1412_v14 = vsel %vm1411_vm3, %v1823_v39, %v1408_v10 }
 0x508   :  { %v1417_v12 = vsel %vm1414_vm4, %v1416_v13, %v1412_v14  ;;  %1598 = vmatpush.msrb.mxu0 %v1589_v35 }
 0x50a   :  { %1599 = vmatpush.msrb.mxu0 %v1588_v7 }
 0x50c   :  { %1600 = vmatpush.msrb.mxu0 %v1587_v57 }
 0x50d   :  { %v1827_v8 = vpop.eup %1826 }
 0x50e   :  { %v1423_v20 = vmul.f32 %v1827_v8, %v1417_v12  ;;  %1601 = vmatpush.msrb.mxu0 %v1586_v0 }
 0x510   :  { %1440 = vmatmul.f32.vlgmr.msra.gmra.mxu0 %v1423_v20  ;;  %1460 = vmatmul.f32.vlgmr.msrb.gmra.mxu1 %v1423_v20 }
 0x511   :  { %1480 = vmatmul.f32.vlgmr.msrb.gmra.mxu2 %v1423_v20  ;;  %1500 = vmatmul.f32.vlgmr.msrb.gmra.mxu3 %v1423_v20 }
 0x512   :  { %1602 = vmatpush.msrb.mxu0 %v1585_v9 }
 0x514   :  { %1603 = vmatpush.msrb.mxu0 %v1584_v46 }
 0x516   :  { %1604 = vmatpush.msrb.mxu0 %v1583_v63 }
 0x518   :  { %1605 = vmatpush.msrb.mxu0 %v1582_v6 }
 0x51a   :  { %1606 = vmatpush.msrb.mxu0 %v1581_v22 }
 0x51c   :  { %1607 = vmatpush.msrb.mxu0 %v1580_v24 }
 0x51e   :  { %1608 = vmatpush.msrb.mxu0 %v1579_v25 }
 0x520   :  { %1609 = vmatpush.msrb.mxu0 %v1578_v27 }
 0x522   :  { %1610 = vmatpush.msrb.mxu0 %v1577_v29 }
 0x524   :  { %1611 = vmatpush.msrb.mxu0 %v1576_v49 }
 0x58d   :  { %v1441_v18 = vpop.f32.mrf.mxu0  ;;  %v1461_v17 = vpop.f32.mrf.mxu1 }
 0x58e   :  { %v1504_v23 = vadd.f32 %v1441_v18, %v3383_v11  ;;  %v1505_v4 = vadd.f32 %v1461_v17, %v3384_v21 }
 0x590   :  { %v1689_v16 = vmul.f32 -1.442695, %v1504_v23  ;;  %v1690_v19 = vmul.f32 -1.442695, %v1505_v4 }
 0x592   :  { %1828 = vpow2.f32 %v1689_v16 }
 0x593   :  { %1830 = vpow2.f32 %v1690_v19 }
 0x594   :  { %v1501_v28 = vpop.f32.mrf.mxu3  ;;  %v1481_v54 = vpop.f32.mrf.mxu2 }
 0x595   :  { %v1507_v32 = vadd.f32 %v1501_v28, %v3385_v31  ;;  %v1506_v43 = vadd.f32 %v1481_v54, %v3386_v34 }
 0x597   :  { %v1691_v26 = vmul.f32 -1.442695, %v1507_v32 }
 0x598   :  { %v1829_v45 = vpop.eup %1828 }
 0x599   :  { %v1831_v33 = vpop.eup %1830  ;;  %v1511_v37 = vadd.f32 1.0, %v1829_v45  ;;  %1832 = vpow2.f32 %v1691_v26 }
 0x59a   :  { %v1530_v15 = vadd.f32 1.0, %v1831_v33 }
 0x59b   :  { %1834 = vrcp.f32 %v1511_v37  ;;  %v1523_v58 = vand.u32 2147483648, %v1511_v37  ;;  %v1521_v42 = vand.u32 2147483647, %v1511_v37  ;;  %vm1517_vm7 = vweird.f32 %v1511_v37 }
 0x59c   :  { %1836 = vrcp.f32 %v1530_v15  ;;  %v1542_v44 = vand.u32 2147483648, %v1530_v15  ;;  %v1540_v47 = vand.u32 2147483647, %v1530_v15  ;;  %vm1536_vm8 = vweird.f32 %v1530_v15 }
 0x59d   :  { %v1524_v1 = vor.u32 1.1754944e-38, %v1523_v58  ;;  %vm1522_vm11 = vcmp.eq.f32.partialorder %v1521_v42, 8.507059e+37 }
 0x59e   :  { %v1543_v62 = vor.u32 1.1754944e-38, %v1542_v44  ;;  %vm1541_vm12 = vcmp.eq.f32.partialorder %v1540_v47, 8.507059e+37 }
 0x59f   :  { %v1833_v50 = vpop.eup %1832 }
 0x5a0   :  { %v1550_v55 = vadd.f32 1.0, %v1833_v50 }
 0x5a1   :  { %v1835_v52 = vpop.eup %1834 }
 0x5a2   :  { %v1837_v56 = vpop.eup %1836  ;;  %v1513_v38 = vmul.f32 %v1835_v52, %v1511_v37  ;;  %1838 = vrcp.f32 %v1550_v55  ;;  %vm1518_vm5 = vweird.f32 %v1835_v52  ;;  %v1562_v7 = vand.u32 2147483648, %v1550_v55 }
 0x5a3   :  { %v1532_v39 = vmul.f32 %v1837_v56, %v1530_v15  ;;  %1840 = vtanh.f32 %v1506_v43  ;;  %vm1537_vm6 = vweird.f32 %v1837_v56  ;;  %vm1519_vm9 = vmor %vm1517_vm7, %vm1518_vm5  ;;  %vm1556_vm14 = vweird.f32 %v1550_v55 }
 0x5a4   :  { %v1514_v51 = vsub.f32 1.0, %v1513_v38  ;;  %vm1538_vm10 = vmor %vm1536_vm8, %vm1537_vm6  ;;  %v1560_v57 = vand.u32 2147483647, %v1550_v55  ;;  %v1563_v9 = vor.u32 1.1754944e-38, %v1562_v7 }
 0x5a5   :  { %v1533_v30 = vsub.f32 1.0, %v1532_v39 }
 0x5a6   :  { %v1515_v40 = vmul.f32 %v1835_v52, %v1514_v51  ;;  %vm1561_vm0 = vcmp.eq.f32.partialorder %v1560_v57, 8.507059e+37 }
 0x5a7   :  { %v1534_v36 = vmul.f32 %v1837_v56, %v1533_v30 }
 0x5a8   :  { %v1839_v41 = vpop.eup %1838  ;;  %v1516_v53 = vadd.f32 %v1835_v52, %v1515_v40 }
 0x5a9   :  { %v1535_v59 = vadd.f32 %v1837_v56, %v1534_v36  ;;  %v1552_v60 = vmul.f32 %v1839_v41, %v1550_v55  ;;  %v1841_v5 = vpop.eup %1840  ;;  %vm1557_vm13 = vweird.f32 %v1839_v41 }
 0x5aa   :  { %v1520_v10 = vsel %vm1519_vm9, %v1835_v52, %v1516_v53  ;;  %vm1558_vm15 = vmor %vm1556_vm14, %vm1557_vm13 }
 0x5ab   :  { %v1525_v2 = vsel %vm1522_vm11, %v1524_v1, %v1520_v10  ;;  %v1539_v14 = vsel %vm1538_vm10, %v1837_v56, %v1535_v59  ;;  %v1553_v13 = vsub.f32 1.0, %v1552_v60 }
 0x5ac   :  { %v1544_v8 = vsel %vm1541_vm12, %v1543_v62, %v1539_v14  ;;  %v1567_v12 = vmul.f32 %v1841_v5, %v1525_v2 }
 0x5ad   :  { %v1566_v20 = vmul.f32 %v1544_v8, %v3063_v3  ;;  %v1554_v61 = vmul.f32 %v1839_v41, %v1553_v13  ;;  %v1715_v3 = vld [vmem:[%s3082_s5] ss:$0 sm:$0xff] }
 0x5af   :  { %v1568_v48 = vadd.f32 %v1567_v12, %v1566_v20  ;;  %v1555_v35 = vadd.f32 %v1839_v41, %v1554_v61 }
 0x5b1   :  { %1842 = vtanh.f32 %v1568_v48  ;;  %v1559_v0 = vsel %vm1558_vm15, %v1839_v41, %v1555_v35 }
 0x5b2   :  { %v1564_v63 = vsel %vm1561_vm0, %v1563_v9, %v1559_v0 }
 0x5b7   :  { %v1843_v46 = vpop.eup %1842 }
 0x5b8   :  { %v1570_v6 = vmul.f32 %v1843_v46, %v1564_v63 }
 0x5ba   :  { %1612 = vmatmul.f32.vlgmr.msrb.gmra.mxu0 %v1570_v6 }
 0x637   :  { %v1613_v18 = vpop.f32.mrf.mxu0 }
 0x638   :  { %v1614_v17 = vadd.f32 %v1715_v3, %v1613_v18 }
 0x63a   :  { %1616 = vst [vmem:[#allocation13] sm:$0xff] %v1614_v17 }
 0x63b   :  { %1627 = dma.vmem_to_hbm [thread:$0]  %s1623_s24, 128, %s1625_s27, [#allocation6]  }
 0x63c   :  { %2058 = dma.done.wait [#allocation6], 128  }
 0x63d   :  { %2059 = vsyncadd [#allocation6], 4294967168 }
 0x63e   :  { %1632 = vsyncpa [#allocation5], 1 }
 0x63f   :  { %1633 = vsyncpa [#allocation8], 1 }
 0x640   :  { %1634 = vsyncpa [#allocation11], 1 }
 0x641   :  { %1635 = vsyncpa [#allocation6], 1 }

</bundles_post_ra>
